<compile_context>
chip_gen: v5e
topology: v5e:2x2
jax: 0.10.0
libtpu: 0.0.40
codegen_flags: <defaults>
</compile_context>

<pallas_src>
import functools

import jax
import jax.numpy as jnp
from jax.experimental import pallas as pl
from jax.experimental.pallas import tpu as pltpu


def _round_up(x, m):
    return ((x + m - 1) // m) * m


# ----------------------------------------------------------------------------
# Pallas kernel: single-K-block GEMM (bf16 in, f32 acc) + bias + LeakyReLU
# ----------------------------------------------------------------------------
def _gemm_bias_lrelu_kernel(a_ref, w_ref, b_ref, o_ref, *,
                            negative_slope, apply_act):
    out = jnp.dot(a_ref[...], w_ref[...], preferred_element_type=jnp.float32)
    out = out + b_ref[...]                     # bias broadcast over rows
    if apply_act:
        out = jnp.where(out >= 0, out, negative_slope * out)
    o_ref[...] = out.astype(o_ref.dtype)


def gemm_bias_lrelu(a, w, b, *, negative_slope=0.1, apply_act=True,
                    out_dtype=jnp.bfloat16, tm_max=1024):
    """a: (M, K), w: (K, N), b: (1, N)  ->  (M, N) out_dtype.

    K and N stay un-padded (full-array blocks); only M is padded/tiled along a
    single "parallel" grid axis.  Operands are cast to bf16 (f32 MXU accum).
    K must fit one block in VMEM (true for every layer routed here).
    """
    M, K = a.shape
    K2, N = w.shape
    assert K == K2 and b.shape == (1, N)

    # --- choose M tile: multiple of 16 (bf16 sublanes), >=2 blocks when
    # possible so both v7x TensorCores are used, capped by a VMEM budget.
    Mp16 = _round_up(M, 16)
    if Mp16 >= 2 * tm_max:
        tm = tm_max
    elif Mp16 >= 256:
        tm = _round_up(Mp16 // 2, 16)
    else:
        tm = Mp16
    # keep the (double-buffered) A block comfortably small for all generations
    while tm > 32 and tm * K * 2 > 4 * 1024 * 1024:
        tm = _round_up(tm // 2, 16)
    Mp = _round_up(Mp16, tm)

    a_p = a.astype(jnp.bfloat16)
    if Mp != M:
        a_p = jnp.pad(a_p, ((0, Mp - M), (0, 0)))
    w_b = w.astype(jnp.bfloat16)
    b_f = b.astype(jnp.float32)

    kernel = functools.partial(_gemm_bias_lrelu_kernel,
                               negative_slope=negative_slope,
                               apply_act=apply_act)

    out_bytes = jnp.dtype(out_dtype).itemsize
    cost = pl.CostEstimate(
        flops=2 * M * N * K, transcendentals=0,
        bytes_accessed=M * K * 2 + K * N * 2 + M * N * out_bytes + N * 4)

    out = pl.pallas_call(
        kernel,
        out_shape=jax.ShapeDtypeStruct((Mp, N), out_dtype),
        grid_spec=pltpu.PrefetchScalarGridSpec(
            num_scalar_prefetch=0,
            grid=(Mp // tm,),
            in_specs=[
                pl.BlockSpec((tm, K), lambda i: (i, 0)),   # A tile
                pl.BlockSpec((K, N), lambda i: (0, 0)),    # full weight
                pl.BlockSpec((1, N), lambda i: (0, 0)),    # bias row
            ],
            out_specs=pl.BlockSpec((tm, N), lambda i: (i, 0)),
        ),
        compiler_params=pltpu.CompilerParams(
            dimension_semantics=("parallel",),
            vmem_limit_bytes=32 * 1024 * 1024),
        cost_estimate=cost,
    )(a_p, w_b, b_f)
    return out[:M] if Mp != M else out


# ----------------------------------------------------------------------------
# Glue: im2col (pure layout ops, no compute) and per-layer conv
# ----------------------------------------------------------------------------
def im2col(x_nhwc, kh, kw, stride, pad):
    N, H, W, C = x_nhwc.shape
    xp = jnp.pad(x_nhwc, ((0, 0), (pad, pad), (pad, pad), (0, 0)))
    OH = (H + 2 * pad - kh) // stride + 1
    OW = (W + 2 * pad - kw) // stride + 1
    patches = []
    for i in range(kh):
        for j in range(kw):
            patches.append(
                xp[:, i:i + stride * OH:stride, j:j + stride * OW:stride, :])
    # (N, OH, OW, KH*KW, C)  -- ordering (kh, kw, c) matches weight packing
    p = jnp.stack(patches, axis=3)
    return p.reshape(N * OH * OW, kh * kw * C), OH, OW


def conv_layer(x_nhwc, w_oihw, b, *, stride, pad, apply_act,
               out_dtype=jnp.bfloat16, quant_bf16=True):
    """Conv2d (PyTorch semantics, OIHW weights) + optional LeakyReLU(0.1)."""
    OC, IC, KH, KW = w_oihw.shape
    Nb = x_nhwc.shape[0]
    # (OC, IC, KH, KW) -> (KH, KW, IC, OC) -> (KH*KW*IC, OC)
    w_mat = jnp.transpose(w_oihw, (2, 3, 1, 0)).reshape(KH * KW * IC, OC)

    # bf16 im2col intermediate (half the HBM bytes of the gather output).
    x_in = x_nhwc.astype(jnp.bfloat16) if quant_bf16 else x_nhwc.astype(jnp.float32)
    cols, OH, OW = im2col(x_in, KH, KW, stride, pad)
    M = cols.shape[0]

    if quant_bf16 and M >= 256:
        # Large GEMMs (layers 1-2): fused Pallas GEMM + bias + LeakyReLU.
        out = gemm_bias_lrelu(cols, w_mat, b.reshape(1, OC).astype(jnp.float32),
                              negative_slope=0.1, apply_act=apply_act,
                              out_dtype=out_dtype)
    else:
        # Tiny GEMMs (layers 3-5): pallas_call dispatch overhead exceeds math.
        w_d = w_mat.astype(jnp.bfloat16) if quant_bf16 else w_mat
        out = jnp.dot(cols, w_d,
                      preferred_element_type=jnp.float32) + b.reshape(1, OC)
        if apply_act:
            out = jnp.where(out >= 0, out, 0.1 * out)
        out = out.astype(out_dtype)
    return out.reshape(Nb, OH, OW, OC)


# ----------------------------------------------------------------------------
# Parameter init (deterministic, PyTorch-Conv2d-style uniform bounds)
# ----------------------------------------------------------------------------
def init_conv_params(key, oc, ic, kh, kw):
    kw_key, kb_key = jax.random.split(key)
    fan_in = ic * kh * kw
    bound = 1.0 / jnp.sqrt(fan_in)
    w = jax.random.uniform(kw_key, (oc, ic, kh, kw), jnp.float32, -bound, bound)
    b = jax.random.uniform(kb_key, (oc,), jnp.float32, -bound, bound)
    return w, b


def make_discriminator_params(key, image_size):
    keys = jax.random.split(key, 5)
    chans = [1, image_size, image_size * 2, image_size * 4, image_size * 8]
    params = []
    for i in range(4):
        params.append(init_conv_params(keys[i], chans[i + 1], chans[i], 4, 4))
    params.append(init_conv_params(keys[4], 1, chans[4], 4, 4))   # self.last
    return params


# ----------------------------------------------------------------------------
# Full forward pass (input/output NCHW to match PyTorch)
# ----------------------------------------------------------------------------
def discriminator_forward(params, x_nchw):
    x = jnp.transpose(x_nchw, (0, 2, 3, 1))  # NCHW -> NHWC
    (w1, b1), (w2, b2), (w3, b3), (w4, b4), (w5, b5) = params
    # layers 1-3 emit bf16 (they feed the next bf16 conv)
    x = conv_layer(x, w1, b1, stride=2, pad=1, apply_act=True,
                   out_dtype=jnp.bfloat16)
    x = conv_layer(x, w2, b2, stride=2, pad=1, apply_act=True,
                   out_dtype=jnp.bfloat16)
    x = conv_layer(x, w3, b3, stride=2, pad=1, apply_act=True,
                   out_dtype=jnp.bfloat16)
    # layer 4 output stays f32: it feeds the f32 final conv
    x = conv_layer(x, w4, b4, stride=2, pad=1, apply_act=True,
                   out_dtype=jnp.float32)
    # self.last: 2x1024x1 GEMM, pure f32 (overhead-dominated in Pallas)
    x = conv_layer(x, w5, b5, stride=1, pad=0, apply_act=False,
                   out_dtype=jnp.float32, quant_bf16=False)
    return jnp.transpose(x, (0, 3, 1, 2))    # NHWC -> NCHW


# Pure-JAX reference (lax conv), quantizing operands to bf16 at the same
# points as the Pallas path so a tight tolerance remains meaningful.
def reference_forward(params, x_nchw):
    def conv(x, w, b, stride, pad, quant=True):
        if quant:
            x = x.astype(jnp.bfloat16)
            w = w.astype(jnp.bfloat16)
        y = jax.lax.conv_general_dilated(
            x, w, window_strides=(stride, stride),
            padding=[(pad, pad), (pad, pad)],
            dimension_numbers=("NCHW", "OIHW", "NCHW"),
            preferred_element_type=jnp.float32)
        return y + b.reshape(1, -1, 1, 1)

    def lrelu(x):
        return jnp.where(x >= 0, x, 0.1 * x)

    (w1, b1), (w2, b2), (w3, b3), (w4, b4), (w5, b5) = params
    x = lrelu(conv(x_nchw, w1, b1, 2, 1))
    x = lrelu(conv(x, w2, b2, 2, 1))
    x = lrelu(conv(x, w3, b3, 2, 1))
    x = lrelu(conv(x, w4, b4, 2, 1))
    return conv(x, w5, b5, 1, 0, quant=False)


if __name__ == "__main__":
    image_size = 8           # channel multiplier (small): 8, 16, 32, 64
    batch = 2
    H = W = 64               # 64 -> 32 -> 16 -> 8 -> 4 -> final 4x4 conv -> 1x1

    key = jax.random.PRNGKey(0)
    pkey, xkey = jax.random.split(key)
    params = make_discriminator_params(pkey, image_size)
    x = jax.random.normal(xkey, (batch, 1, H, W), jnp.float32)

    fwd = jax.jit(discriminator_forward)
    out = jax.block_until_ready(fwd(params, x))
    assert out.shape == (batch, 1, 1, 1), out.shape

    ref = jax.block_until_ready(jax.jit(reference_forward)(params, x))
    if not jnp.allclose(out, ref, atol=2e-3, rtol=2e-3):
        raise AssertionError("Pallas output mismatch vs lax.conv reference")

    print("KERNEL_OK")
</pallas_src>

<mosaic_0001>
module attributes {stable_mosaic.version = 11 : i64} {
  func.func @_gemm_bias_lrelu_kernel(%arg0: i32, %arg1: memref<1024x16xbf16, #tpu.memory_space<vmem>>, %arg2: memref<16x8xbf16, #tpu.memory_space<vmem>>, %arg3: memref<1x8xf32, #tpu.memory_space<vmem>>, %arg4: memref<1024x8xbf16, #tpu.memory_space<vmem>>) attributes {dimension_semantics = [#tpu.dimension_semantics<parallel>], iteration_bounds = array<i64: 2>, scalar_prefetch = 0 : i64, scratch_operands = 0 : i64, tpu.core_type = #tpu.core_type<tc>, window_params = [{transform_indices = @transform_0, window_bounds = array<i64: 1024, 16>}, {pipeline_mode = #tpu.pipeline_mode<synchronous>, transform_indices = @transform_1, window_bounds = array<i64: 16, 8>}, {pipeline_mode = #tpu.pipeline_mode<synchronous>, transform_indices = @transform_2, window_bounds = array<i64: 1, 8>}, {transform_indices = @transform_3, window_bounds = array<i64: 1024, 8>}]} {
    %c0 = arith.constant 0 : index
    %c0_0 = arith.constant 0 : index
    %0 = vector.load %arg1[%c0, %c0_0] : memref<1024x16xbf16, #tpu.memory_space<vmem>>, vector<1024x16xbf16>
    %c0_1 = arith.constant 0 : index
    %c0_2 = arith.constant 0 : index
    %1 = vector.load %arg2[%c0_1, %c0_2] : memref<16x8xbf16, #tpu.memory_space<vmem>>, vector<16x8xbf16>
    %cst = arith.constant dense<0.000000e+00> : vector<1024x8xf32>
    %2 = tpu.matmul %0, %1, %cst {dimension_numbers = #tpu.dot_dimension_numbers<[1], [0], [0], [1], [0, 0, 1, 1], [], []>} : vector<1024x16xbf16>, vector<16x8xbf16>, vector<1024x8xf32> -> vector<1024x8xf32>
    %c0_3 = arith.constant 0 : index
    %c0_4 = arith.constant 0 : index
    %3 = vector.load %arg3[%c0_3, %c0_4] : memref<1x8xf32, #tpu.memory_space<vmem>>, vector<1x8xf32>
    %4 = vector.broadcast %3 : vector<1x8xf32> to vector<1024x8xf32>
    %5 = arith.addf %2, %4 : vector<1024x8xf32>
    %cst_5 = arith.constant 0.000000e+00 : f32
    %6 = vector.broadcast %cst_5 : f32 to vector<1024x8xf32>
    %7 = arith.cmpf oge, %5, %6 : vector<1024x8xf32>
    %cst_6 = arith.constant 1.000000e-01 : f32
    %8 = vector.broadcast %cst_6 : f32 to vector<1024x8xf32>
    %9 = arith.mulf %8, %5 : vector<1024x8xf32>
    %10 = arith.select %7, %5, %9 : vector<1024x8xi1>, vector<1024x8xf32>
    %11 = arith.truncf %10 : vector<1024x8xf32> to vector<1024x8xbf16>
    %c0_7 = arith.constant 0 : index
    %c0_8 = arith.constant 0 : index
    %12 = vector.load %arg4[%c0_7, %c0_8] : memref<1024x8xbf16, #tpu.memory_space<vmem>>, vector<1024x8xbf16>
    tpu.vector_store %arg4[%c0_7, %c0_8], %11 {strides = array<i32>} : memref<1024x8xbf16, #tpu.memory_space<vmem>>, vector<1024x8xbf16>,
    return
  }
  func.func @transform_0(%arg0: i32) -> (i32, i32) {
    %c0_i32 = arith.constant 0 : i32
    %c0_i32_0 = arith.constant 0 : i32
    return %arg0, %c0_i32 : i32, i32
  }
  func.func @transform_1(%arg0: i32) -> (i32, i32) {
    %c0_i32 = arith.constant 0 : i32
    %c0_i32_0 = arith.constant 0 : i32
    %c0_i32_1 = arith.constant 0 : i32
    return %c0_i32, %c0_i32_0 : i32, i32
  }
  func.func @transform_2(%arg0: i32) -> (i32, i32) {
    %c0_i32 = arith.constant 0 : i32
    %c0_i32_0 = arith.constant 0 : i32
    %c0_i32_1 = arith.constant 0 : i32
    return %c0_i32, %c0_i32_0 : i32, i32
  }
  func.func @transform_3(%arg0: i32) -> (i32, i32) {
    %c0_i32 = arith.constant 0 : i32
    %c0_i32_0 = arith.constant 0 : i32
    return %arg0, %c0_i32 : i32, i32
  }
}

module attributes {stable_mosaic.version = 11 : i64} {
  func.func @_gemm_bias_lrelu_kernel(%arg0: i32, %arg1: memref<256x128xbf16, #tpu.memory_space<vmem>>, %arg2: memref<128x16xbf16, #tpu.memory_space<vmem>>, %arg3: memref<1x16xf32, #tpu.memory_space<vmem>>, %arg4: memref<256x16xbf16, #tpu.memory_space<vmem>>) attributes {dimension_semantics = [#tpu.dimension_semantics<parallel>], iteration_bounds = array<i64: 2>, scalar_prefetch = 0 : i64, scratch_operands = 0 : i64, tpu.core_type = #tpu.core_type<tc>, window_params = [{transform_indices = @transform_0, window_bounds = array<i64: 256, 128>}, {pipeline_mode = #tpu.pipeline_mode<synchronous>, transform_indices = @transform_1, window_bounds = array<i64: 128, 16>}, {pipeline_mode = #tpu.pipeline_mode<synchronous>, transform_indices = @transform_2, window_bounds = array<i64: 1, 16>}, {transform_indices = @transform_3, window_bounds = array<i64: 256, 16>}]} {
    %c0 = arith.constant 0 : index
    %c0_0 = arith.constant 0 : index
    %0 = vector.load %arg1[%c0, %c0_0] : memref<256x128xbf16, #tpu.memory_space<vmem>>, vector<256x128xbf16>
    %c0_1 = arith.constant 0 : index
    %c0_2 = arith.constant 0 : index
    %1 = vector.load %arg2[%c0_1, %c0_2] : memref<128x16xbf16, #tpu.memory_space<vmem>>, vector<128x16xbf16>
    %cst = arith.constant dense<0.000000e+00> : vector<256x16xf32>
    %2 = tpu.matmul %0, %1, %cst {dimension_numbers = #tpu.dot_dimension_numbers<[1], [0], [0], [1], [0, 0, 1, 1], [], []>} : vector<256x128xbf16>, vector<128x16xbf16>, vector<256x16xf32> -> vector<256x16xf32>
    %c0_3 = arith.constant 0 : index
    %c0_4 = arith.constant 0 : index
    %3 = vector.load %arg3[%c0_3, %c0_4] : memref<1x16xf32, #tpu.memory_space<vmem>>, vector<1x16xf32>
    %4 = vector.broadcast %3 : vector<1x16xf32> to vector<256x16xf32>
    %5 = arith.addf %2, %4 : vector<256x16xf32>
    %cst_5 = arith.constant 0.000000e+00 : f32
    %6 = vector.broadcast %cst_5 : f32 to vector<256x16xf32>
    %7 = arith.cmpf oge, %5, %6 : vector<256x16xf32>
    %cst_6 = arith.constant 1.000000e-01 : f32
    %8 = vector.broadcast %cst_6 : f32 to vector<256x16xf32>
    %9 = arith.mulf %8, %5 : vector<256x16xf32>
    %10 = arith.select %7, %5, %9 : vector<256x16xi1>, vector<256x16xf32>
    %11 = arith.truncf %10 : vector<256x16xf32> to vector<256x16xbf16>
    %c0_7 = arith.constant 0 : index
    %c0_8 = arith.constant 0 : index
    %12 = vector.load %arg4[%c0_7, %c0_8] : memref<256x16xbf16, #tpu.memory_space<vmem>>, vector<256x16xbf16>
    tpu.vector_store %arg4[%c0_7, %c0_8], %11 {strides = array<i32>} : memref<256x16xbf16, #tpu.memory_space<vmem>>, vector<256x16xbf16>,
    return
  }
  func.func @transform_0(%arg0: i32) -> (i32, i32) {
    %c0_i32 = arith.constant 0 : i32
    %c0_i32_0 = arith.constant 0 : i32
    return %arg0, %c0_i32 : i32, i32
  }
  func.func @transform_1(%arg0: i32) -> (i32, i32) {
    %c0_i32 = arith.constant 0 : i32
    %c0_i32_0 = arith.constant 0 : i32
    %c0_i32_1 = arith.constant 0 : i32
    return %c0_i32, %c0_i32_0 : i32, i32
  }
  func.func @transform_2(%arg0: i32) -> (i32, i32) {
    %c0_i32 = arith.constant 0 : i32
    %c0_i32_0 = arith.constant 0 : i32
    %c0_i32_1 = arith.constant 0 : i32
    return %c0_i32, %c0_i32_0 : i32, i32
  }
  func.func @transform_3(%arg0: i32) -> (i32, i32) {
    %c0_i32 = arith.constant 0 : i32
    %c0_i32_0 = arith.constant 0 : i32
    return %arg0, %c0_i32 : i32, i32
  }
}

</mosaic_0001>

<bundles_post_ra>
// kernel: discriminator_forward.2
= control target key start
LH: loop header
LB: loop body
LE: loop exit
PB: predicated region body
PF: predicated region fallthrough
CT: control target
= control target key end

     0   :  { %s2295_s12 = smov 0   ;;  %s2848_s0 = inlined_call_operand.vmem [shape: bf16[2048,16], index: 0, kind: input, shape index: {}]   ;;  %s2849_s1 = inlined_call_operand.vmem [shape: bf16[16,8], index: 1, kind: input, shape index: {}]   ;;  %s2850_s2 = inlined_call_operand.vmem [shape: f32[1,8], index: 2, kind: input, shape index: {}]   ;;  %s2851_s3 = inlined_call_operand.vmem [shape: bf16[2048,8], index: 3, kind: output, shape index: {}]  }
   0x1 LB: > { %s1854_s13 = sadd.s32 4294967295, %s2273_s12   ;;  %p1858_p0 = scmp.ge.s32.totalorder %s2273_s12, 1  ;;  %s2273_s12 = sphi %s2295_s12, %s13_s12  }
   0x2   : > { %p138_p1 = scmp.lt.s32.totalorder %s2273_s12, 3 }
   0x4   : > { %p139_p2 = pnand %p1858_p0, %p138_p1 }
   0x5   : > { %s1859_s16 = sshll.u32 (!%p139_p2), %s1854_s13, 7 }
   0x6   : > { %142 = sbr.rel (%p139_p2) target bundleno = 406 (0x196), region = 32  ;;  %p163_p3 = scmp.lt.s32.totalorder (!%p139_p2), %s1859_s16, 255 }
   0xb   : > { %v2253_v0 = vld [vmem:[%s2849_s1] sm:$0xff]  ;;  %s2853_s16 = smov (!%p163_p3, %s1859_s16), 255  ;;  %vm635_vm0 = vcmask 130048   ;;  %vm1669_vm3 = vcmask 60416  }
   0xc   : > { %835 = vmatpush.bf16.msra.mxu0 %v2253_v0  ;;  %2254 = vmatpush.bf16.msra.mxu1 %v2253_v0  ;;  %s1860_s17 = sshll.u32 %s2853_s16, 2  ;;  %v2383_v33 = vld [vmem:[%s2850_s2] ss:$0 sm:$0xff] }
   0xd   : > { %2255 = vmatpush.bf16.msra.mxu2 %v2253_v0  ;;  %2256 = vmatpush.bf16.msra.mxu3 %v2253_v0  ;;  %s2314_s20 = scalar_lea.vmem %s2848_s0, %s1860_s17  ;;  %s2400_s25 = scalar_lea.vmem %s2851_s3, %s1860_s17 }
   0xe   : > { %v2189_v1 = vld [vmem:[%s2314_s20] sm:$0xff]  ;;  %v2190_v5 = vld [vmem:[%s2314_s20 + $0x8] sm:$0xff]  ;;  %v2191_v9 = vld [vmem:[%s2314_s20 + $0x10] sm:$0xff] }
   0xf   : > { %v2205_v2 = vld [vmem:[%s2314_s20 + $0x80] sm:$0xff]  ;;  %2123 = vmatmul.msk.bf16.vlgmr.msra.gmra.mxu0 %vm635_vm0, %v2189_v1  ;;  %v2206_v6 = vld [vmem:[%s2314_s20 + $0x88] sm:$0xff]  ;;  %v2207_v10 = vld [vmem:[%s2314_s20 + $0x90] sm:$0xff] }
  0x10   : > { %v2221_v3 = vld [vmem:[%s2314_s20 + $0x100] sm:$0xff]  ;;  %2139 = vmatmul.msk.bf16.vlgmr.msra.gmra.mxu1 %vm635_vm0, %v2205_v2  ;;  %v2222_v7 = vld [vmem:[%s2314_s20 + $0x108] sm:$0xff]  ;;  %v2223_v11 = vld [vmem:[%s2314_s20 + $0x110] sm:$0xff] }
  0x11   : > { %v2237_v4 = vld [vmem:[%s2314_s20 + $0x180] sm:$0xff]  ;;  %2155 = vmatmul.msk.bf16.vlgmr.msra.gmra.mxu2 %vm635_vm0, %v2221_v3  ;;  %v2238_v8 = vld [vmem:[%s2314_s20 + $0x188] sm:$0xff]  ;;  %v2239_v12 = vld [vmem:[%s2314_s20 + $0x190] sm:$0xff] }
  0x12   : > { %2171 = vmatmul.msk.bf16.vlgmr.msra.gmra.mxu3 %vm635_vm0, %v2237_v4  ;;  %v2192_v13 = vld [vmem:[%s2314_s20 + $0x18] sm:$0xff]  ;;  %v2193_v17 = vld [vmem:[%s2314_s20 + $0x20] sm:$0xff]  ;;  %v2194_v21 = vld [vmem:[%s2314_s20 + $0x28] sm:$0xff] }
  0x13   : > { %v2208_v14 = vld [vmem:[%s2314_s20 + $0x98] sm:$0xff]  ;;  %v2209_v18 = vld [vmem:[%s2314_s20 + $0xa0] sm:$0xff]  ;;  %v2210_v22 = vld [vmem:[%s2314_s20 + $0xa8] sm:$0xff] }
  0x14   : > { %v2224_v15 = vld [vmem:[%s2314_s20 + $0x118] sm:$0xff]  ;;  %v2225_v19 = vld [vmem:[%s2314_s20 + $0x120] sm:$0xff]  ;;  %v2226_v23 = vld [vmem:[%s2314_s20 + $0x128] sm:$0xff] }
  0x15   : > { %v2240_v16 = vld [vmem:[%s2314_s20 + $0x198] sm:$0xff]  ;;  %v2241_v20 = vld [vmem:[%s2314_s20 + $0x1a0] sm:$0xff]  ;;  %v2242_v24 = vld [vmem:[%s2314_s20 + $0x1a8] sm:$0xff] }
  0x16   : > { %v2195_v25 = vld [vmem:[%s2314_s20 + $0x30] sm:$0xff]  ;;  %v2196_v29 = vld [vmem:[%s2314_s20 + $0x38] sm:$0xff]  ;;  %v2197_v34 = vld [vmem:[%s2314_s20 + $0x40] sm:$0xff] }
  0x17   : > { %v2211_v26 = vld [vmem:[%s2314_s20 + $0xb0] sm:$0xff]  ;;  %v2212_v30 = vld [vmem:[%s2314_s20 + $0xb8] sm:$0xff]  ;;  %v2213_v35 = vld [vmem:[%s2314_s20 + $0xc0] sm:$0xff] }
  0x18   : > { %v2227_v27 = vld [vmem:[%s2314_s20 + $0x130] sm:$0xff]  ;;  %v2228_v31 = vld [vmem:[%s2314_s20 + $0x138] sm:$0xff]  ;;  %v2229_v38 = vld [vmem:[%s2314_s20 + $0x140] sm:$0xff] }
  0x19   : > { %v2243_v28 = vld [vmem:[%s2314_s20 + $0x1b0] sm:$0xff]  ;;  %v2244_v32 = vld [vmem:[%s2314_s20 + $0x1b8] sm:$0xff]  ;;  %v2245_v39 = vld [vmem:[%s2314_s20 + $0x1c0] sm:$0xff] }
  0x1f   : > { %2124 = vmatmul.msk.bf16.gmra.mxu0 %vm635_vm0, %v2190_v5 }
  0x20   : > { %2140 = vmatmul.msk.bf16.gmra.mxu1 %vm635_vm0, %v2206_v6  ;;  %v2198_v6 = vld [vmem:[%s2314_s20 + $0x48] sm:$0xff] }
  0x21   : > { %2156 = vmatmul.msk.bf16.gmra.mxu2 %vm635_vm0, %v2222_v7  ;;  %v2214_v7 = vld [vmem:[%s2314_s20 + $0xc8] sm:$0xff] }
  0x22   : > { %2172 = vmatmul.msk.bf16.gmra.mxu3 %vm635_vm0, %v2238_v8 }
  0x2f   : > { %2125 = vmatmul.msk.bf16.gmra.mxu0 %vm635_vm0, %v2191_v9 }
  0x30   : > { %2141 = vmatmul.msk.bf16.gmra.mxu1 %vm635_vm0, %v2207_v10 }
  0x31   : > { %2157 = vmatmul.msk.bf16.gmra.mxu2 %vm635_vm0, %v2223_v11 }
  0x32   : > { %2173 = vmatmul.msk.bf16.gmra.mxu3 %vm635_vm0, %v2239_v12  ;;  %v2230_v12 = vld [vmem:[%s2314_s20 + $0x148] sm:$0xff] }
  0x3f   : > { %2126 = vmatmul.msk.bf16.gmra.mxu0 %vm635_vm0, %v2192_v13  ;;  %v2246_v13 = vld [vmem:[%s2314_s20 + $0x1c8] sm:$0xff] }
  0x40   : > { %2142 = vmatmul.msk.bf16.gmra.mxu1 %vm635_vm0, %v2208_v14 }
  0x41   : > { %2158 = vmatmul.msk.bf16.gmra.mxu2 %vm635_vm0, %v2224_v15 }
  0x42   : > { %2174 = vmatmul.msk.bf16.gmra.mxu3 %vm635_vm0, %v2240_v16 }
  0x4f   : > { %2127 = vmatmul.msk.bf16.gmra.mxu0 %vm635_vm0, %v2193_v17 }
  0x50   : > { %2143 = vmatmul.msk.bf16.gmra.mxu1 %vm635_vm0, %v2209_v18 }
  0x51   : > { %2159 = vmatmul.msk.bf16.gmra.mxu2 %vm635_vm0, %v2225_v19 }
  0x52   : > { %2175 = vmatmul.msk.bf16.gmra.mxu3 %vm635_vm0, %v2241_v20 }
  0x5f   : > { %2128 = vmatmul.msk.bf16.gmra.mxu0 %vm635_vm0, %v2194_v21 }
  0x60   : > { %2144 = vmatmul.msk.bf16.gmra.mxu1 %vm635_vm0, %v2210_v22 }
  0x61   : > { %2160 = vmatmul.msk.bf16.gmra.mxu2 %vm635_vm0, %v2226_v23 }
  0x62   : > { %2176 = vmatmul.msk.bf16.gmra.mxu3 %vm635_vm0, %v2242_v24 }
  0x6f   : > { %2129 = vmatmul.msk.bf16.gmra.mxu0 %vm635_vm0, %v2195_v25 }
  0x70   : > { %2145 = vmatmul.msk.bf16.gmra.mxu1 %vm635_vm0, %v2211_v26 }
  0x71   : > { %2161 = vmatmul.msk.bf16.gmra.mxu2 %vm635_vm0, %v2227_v27 }
  0x72   : > { %2177 = vmatmul.msk.bf16.gmra.mxu3 %vm635_vm0, %v2243_v28 }
  0x7f   : > { %2130 = vmatmul.msk.bf16.gmra.mxu0 %vm635_vm0, %v2196_v29 }
  0x80   : > { %2146 = vmatmul.msk.bf16.gmra.mxu1 %vm635_vm0, %v2212_v30 }
  0x81   : > { %2162 = vmatmul.msk.bf16.gmra.mxu2 %vm635_vm0, %v2228_v31 }
  0x82   : > { %2178 = vmatmul.msk.bf16.gmra.mxu3 %vm635_vm0, %v2244_v32 }
  0x8c   : > { %v837_v36 = vpop.f32.mrf.mxu0 }
  0x8d   : > { %v917_v37 = vpop.f32.mrf.mxu1  ;;  %v838_v40 = vadd.f32 %v2383_v33, %v837_v36 }
  0x8e   : > { %v918_v41 = vadd.f32 %v2383_v33, %v917_v37 }
  0x8f   : > { %vm1157_vm1 = vcmp.ge.f32.partialorder %v838_v40, 0.0  ;;  %v1285_v42 = vmul.f32 0.1, %v838_v40  ;;  %2131 = vmatmul.msk.bf16.gmra.mxu0 %vm635_vm0, %v2197_v34 }
  0x90   : > { %vm1189_vm2 = vcmp.ge.f32.partialorder %v918_v41, 0.0  ;;  %v1317_v43 = vmul.f32 0.1, %v918_v41  ;;  %2147 = vmatmul.msk.bf16.gmra.mxu1 %vm635_vm0, %v2213_v35 }
  0x91   : > { %2163 = vmatmul.msk.bf16.gmra.mxu2 %vm635_vm0, %v2229_v38  ;;  %v1413_v44 = vsel %vm1157_vm1, %v838_v40, %v1285_v42 }
  0x92   : > { %2179 = vmatmul.msk.bf16.gmra.mxu3 %vm635_vm0, %v2245_v39  ;;  %v1445_v45 = vsel %vm1189_vm2, %v918_v41, %v1317_v43  ;;  %v1541_v46 = vpack.c.bf16 %v1413_v44, %v1413_v44 }
  0x93   : > { %v1573_v47 = vpack.c.bf16 %v1445_v45, %v1445_v45 }
  0x94   : > { %v997_v48 = vpop.f32.mrf.mxu2  ;;  %1670 = vst.msk [vmem:[%s2400_s25] sm:$0xf] %vm1669_vm3, %v1541_v46  ;;  %v839_v52 = vpop.f32.mrf.mxu0 }
  0x95   : > { %v1077_v49 = vpop.f32.mrf.mxu3  ;;  %v998_v50 = vadd.f32 %v2383_v33, %v997_v48  ;;  %v919_v53 = vpop.f32.mrf.mxu1  ;;  %1702 = vst.msk [vmem:[%s2400_s25 + $0x80] sm:$0xf] %vm1669_vm3, %v1573_v47  ;;  %v840_v54 = vadd.f32 %v2383_v33, %v839_v52  ;;  %v2215_v52 = vld [vmem:[%s2314_s20 + $0xd0] sm:$0xff] }
  0x96   : > { %v1078_v51 = vadd.f32 %v2383_v33, %v1077_v49  ;;  %v920_v55 = vadd.f32 %v2383_v33, %v919_v53 }
  0x97   : > { %vm1221_vm4 = vcmp.ge.f32.partialorder %v998_v50, 0.0  ;;  %v1349_v56 = vmul.f32 0.1, %v998_v50  ;;  %vm1158_vm6 = vcmp.ge.f32.partialorder %v840_v54, 0.0  ;;  %v1286_v58 = vmul.f32 0.1, %v840_v54 }
  0x98   : > { %vm1253_vm5 = vcmp.ge.f32.partialorder %v1078_v51, 0.0  ;;  %v1381_v57 = vmul.f32 0.1, %v1078_v51  ;;  %vm1190_vm7 = vcmp.ge.f32.partialorder %v920_v55, 0.0  ;;  %v1318_v59 = vmul.f32 0.1, %v920_v55 }
  0x99   : > { %v1477_v60 = vsel %vm1221_vm4, %v998_v50, %v1349_v56  ;;  %v1414_v0 = vsel %vm1158_vm6, %v840_v54, %v1286_v58  ;;  %v2247_v58 = vld [vmem:[%s2314_s20 + $0x1d0] sm:$0xff] }
  0x9a   : > { %v1509_v61 = vsel %vm1253_vm5, %v1078_v51, %v1381_v57  ;;  %v1605_v62 = vpack.c.bf16 %v1477_v60, %v1477_v60  ;;  %v1446_v1 = vsel %vm1190_vm7, %v920_v55, %v1318_v59  ;;  %v1542_v2 = vpack.c.bf16 %v1414_v0, %v1414_v0  ;;  %v2199_v51 = vld [vmem:[%s2314_s20 + $0x50] sm:$0xff] }
  0x9b   : > { %v1637_v63 = vpack.c.bf16 %v1509_v61, %v1509_v61  ;;  %v1574_v3 = vpack.c.bf16 %v1446_v1, %v1446_v1  ;;  %v2231_v57 = vld [vmem:[%s2314_s20 + $0x150] sm:$0xff] }
  0x9c   : > { %1734 = vst.msk [vmem:[%s2400_s25 + $0x100] sm:$0xf] %vm1669_vm3, %v1605_v62  ;;  %v999_v4 = vpop.f32.mrf.mxu2  ;;  %v842_v10 = vpop.f32.mrf.mxu0 }
  0x9d   : > { %v1079_v5 = vpop.f32.mrf.mxu3  ;;  %1766 = vst.msk [vmem:[%s2400_s25 + $0x180] sm:$0xf] %vm1669_vm3, %v1637_v63  ;;  %v1000_v8 = vadd.f32 %v2383_v33, %v999_v4  ;;  %v922_v11 = vpop.f32.mrf.mxu1  ;;  %v843_v14 = vadd.f32 %v2383_v33, %v842_v10 }
  0x9e   : > { %v1080_v9 = vadd.f32 %v2383_v33, %v1079_v5  ;;  %1671 = vst.msk [vmem:[%s2400_s25 + $0x4] sm:$0xf] %vm1669_vm3, %v1542_v2  ;;  %v923_v15 = vadd.f32 %v2383_v33, %v922_v11 }
  0x9f   : > { %1703 = vst.msk [vmem:[%s2400_s25 + $0x84] sm:$0xf] %vm1669_vm3, %v1574_v3  ;;  %vm1222_vm8 = vcmp.ge.f32.partialorder %v1000_v8, 0.0  ;;  %v1350_v16 = vmul.f32 0.1, %v1000_v8  ;;  %vm1159_vm10 = vcmp.ge.f32.partialorder %v843_v14, 0.0  ;;  %2132 = vmatmul.msk.bf16.gmra.mxu0 %vm635_vm0, %v2198_v6 }
  0xa0   : > { %vm1254_vm9 = vcmp.ge.f32.partialorder %v1080_v9, 0.0  ;;  %v1382_v17 = vmul.f32 0.1, %v1080_v9  ;;  %v1287_v18 = vmul.f32 0.1, %v843_v14  ;;  %vm1191_vm11 = vcmp.ge.f32.partialorder %v923_v15, 0.0  ;;  %2148 = vmatmul.msk.bf16.gmra.mxu1 %vm635_vm0, %v2214_v7 }
  0xa1   : > { %v1478_v19 = vsel %vm1222_vm8, %v1000_v8, %v1350_v16  ;;  %v1319_v20 = vmul.f32 0.1, %v923_v15  ;;  %2164 = vmatmul.msk.bf16.gmra.mxu2 %vm635_vm0, %v2230_v12 }
  0xa2   : > { %2180 = vmatmul.msk.bf16.gmra.mxu3 %vm635_vm0, %v2246_v13  ;;  %v1606_v21 = vpack.c.bf16 %v1478_v19, %v1478_v19  ;;  %v1510_v22 = vsel %vm1254_vm9, %v1080_v9, %v1382_v17  ;;  %v1415_v23 = vsel %vm1159_vm10, %v843_v14, %v1287_v18 }
  0xa3   : > { %v1638_v24 = vpack.c.bf16 %v1510_v22, %v1510_v22  ;;  %v1543_v25 = vpack.c.bf16 %v1415_v23, %v1415_v23  ;;  %v1447_v26 = vsel %vm1191_vm11, %v923_v15, %v1319_v20 }
  0xa4   : > { %1735 = vst.msk [vmem:[%s2400_s25 + $0x104] sm:$0xf] %vm1669_vm3, %v1606_v21  ;;  %v1575_v27 = vpack.c.bf16 %v1447_v26, %v1447_v26  ;;  %v1002_v28 = vpop.f32.mrf.mxu2  ;;  %v844_v32 = vpop.f32.mrf.mxu0 }
  0xa5   : > { %v1082_v29 = vpop.f32.mrf.mxu3  ;;  %1767 = vst.msk [vmem:[%s2400_s25 + $0x184] sm:$0xf] %vm1669_vm3, %v1638_v24  ;;  %v1003_v30 = vadd.f32 %v2383_v33, %v1002_v28  ;;  %v924_v34 = vpop.f32.mrf.mxu1  ;;  %v845_v35 = vadd.f32 %v2383_v33, %v844_v32  ;;  %v2216_v32 = vld [vmem:[%s2314_s20 + $0xd8] sm:$0xff] }
  0xa6   : > { %v1083_v31 = vadd.f32 %v2383_v33, %v1082_v29  ;;  %1672 = vst.msk [vmem:[%s2400_s25 + $0x8] sm:$0xf] %vm1669_vm3, %v1543_v25  ;;  %v925_v36 = vadd.f32 %v2383_v33, %v924_v34 }
  0xa7   : > { %1704 = vst.msk [vmem:[%s2400_s25 + $0x88] sm:$0xf] %vm1669_vm3, %v1575_v27  ;;  %vm1223_vm12 = vcmp.ge.f32.partialorder %v1003_v30, 0.0  ;;  %v1351_v37 = vmul.f32 0.1, %v1003_v30  ;;  %vm1160_vm14 = vcmp.ge.f32.partialorder %v845_v35, 0.0 }
  0xa8   : > { %vm1255_vm13 = vcmp.ge.f32.partialorder %v1083_v31, 0.0  ;;  %v1383_v38 = vmul.f32 0.1, %v1083_v31  ;;  %v1288_v39 = vmul.f32 0.1, %v845_v35  ;;  %vm1192_vm15 = vcmp.ge.f32.partialorder %v925_v36, 0.0 }
  0xa9   : > { %v1479_v40 = vsel %vm1223_vm12, %v1003_v30, %v1351_v37  ;;  %v1320_v41 = vmul.f32 0.1, %v925_v36 }
  0xaa   : > { %v1607_v42 = vpack.c.bf16 %v1479_v40, %v1479_v40  ;;  %v1511_v43 = vsel %vm1255_vm13, %v1083_v31, %v1383_v38  ;;  %v1416_v44 = vsel %vm1160_vm14, %v845_v35, %v1288_v39  ;;  %v2200_v31 = vld [vmem:[%s2314_s20 + $0x58] sm:$0xff] }
  0xab   : > { %v1639_v45 = vpack.c.bf16 %v1511_v43, %v1511_v43  ;;  %v1544_v46 = vpack.c.bf16 %v1416_v44, %v1416_v44  ;;  %v1448_v47 = vsel %vm1192_vm15, %v925_v36, %v1320_v41  ;;  %v2232_v38 = vld [vmem:[%s2314_s20 + $0x158] sm:$0xff] }
  0xac   : > { %1736 = vst.msk [vmem:[%s2400_s25 + $0x108] sm:$0xf] %vm1669_vm3, %v1607_v42  ;;  %v1576_v48 = vpack.c.bf16 %v1448_v47, %v1448_v47  ;;  %v1004_v49 = vpop.f32.mrf.mxu2  ;;  %v847_v55 = vpop.f32.mrf.mxu0  ;;  %v2248_v39 = vld [vmem:[%s2314_s20 + $0x1d8] sm:$0xff] }
  0xad   : > { %v1084_v50 = vpop.f32.mrf.mxu3  ;;  %1768 = vst.msk [vmem:[%s2400_s25 + $0x188] sm:$0xf] %vm1669_vm3, %v1639_v45  ;;  %v1005_v53 = vadd.f32 %v2383_v33, %v1004_v49  ;;  %v927_v56 = vpop.f32.mrf.mxu1  ;;  %v848_v59 = vadd.f32 %v2383_v33, %v847_v55 }
  0xae   : > { %v1085_v54 = vadd.f32 %v2383_v33, %v1084_v50  ;;  %1673 = vst.msk [vmem:[%s2400_s25 + $0xc] sm:$0xf] %vm1669_vm3, %v1544_v46  ;;  %v928_v60 = vadd.f32 %v2383_v33, %v927_v56 }
  0xaf   : > { %1705 = vst.msk [vmem:[%s2400_s25 + $0x8c] sm:$0xf] %vm1669_vm3, %v1576_v48  ;;  %vm1224_vm1 = vcmp.ge.f32.partialorder %v1005_v53, 0.0  ;;  %v1352_v61 = vmul.f32 0.1, %v1005_v53  ;;  %vm1161_vm4 = vcmp.ge.f32.partialorder %v848_v59, 0.0  ;;  %2133 = vmatmul.msk.bf16.gmra.mxu0 %vm635_vm0, %v2199_v51 }
  0xb0   : > { %vm1256_vm2 = vcmp.ge.f32.partialorder %v1085_v54, 0.0  ;;  %v1384_v62 = vmul.f32 0.1, %v1085_v54  ;;  %v1289_v63 = vmul.f32 0.1, %v848_v59  ;;  %vm1193_vm5 = vcmp.ge.f32.partialorder %v928_v60, 0.0  ;;  %2149 = vmatmul.msk.bf16.gmra.mxu1 %vm635_vm0, %v2215_v52 }
  0xb1   : > { %v1480_v0 = vsel %vm1224_vm1, %v1005_v53, %v1352_v61  ;;  %v1321_v1 = vmul.f32 0.1, %v928_v60  ;;  %2165 = vmatmul.msk.bf16.gmra.mxu2 %vm635_vm0, %v2231_v57 }
  0xb2   : > { %2181 = vmatmul.msk.bf16.gmra.mxu3 %vm635_vm0, %v2247_v58  ;;  %v1608_v2 = vpack.c.bf16 %v1480_v0, %v1480_v0  ;;  %v1512_v3 = vsel %vm1256_vm2, %v1085_v54, %v1384_v62  ;;  %v1417_v4 = vsel %vm1161_vm4, %v848_v59, %v1289_v63 }
  0xb3   : > { %v1640_v5 = vpack.c.bf16 %v1512_v3, %v1512_v3  ;;  %v1545_v6 = vpack.c.bf16 %v1417_v4, %v1417_v4  ;;  %v1449_v7 = vsel %vm1193_vm5, %v928_v60, %v1321_v1 }
  0xb4   : > { %1737 = vst.msk [vmem:[%s2400_s25 + $0x10c] sm:$0xf] %vm1669_vm3, %v1608_v2  ;;  %v1577_v8 = vpack.c.bf16 %v1449_v7, %v1449_v7  ;;  %v1007_v9 = vpop.f32.mrf.mxu2  ;;  %v849_v13 = vpop.f32.mrf.mxu0 }
  0xb5   : > { %v1087_v10 = vpop.f32.mrf.mxu3  ;;  %1769 = vst.msk [vmem:[%s2400_s25 + $0x18c] sm:$0xf] %vm1669_vm3, %v1640_v5  ;;  %v1008_v11 = vadd.f32 %v2383_v33, %v1007_v9  ;;  %v929_v14 = vpop.f32.mrf.mxu1  ;;  %v850_v15 = vadd.f32 %v2383_v33, %v849_v13  ;;  %v2217_v13 = vld [vmem:[%s2314_s20 + $0xe0] sm:$0xff] }
  0xb6   : > { %v1088_v12 = vadd.f32 %v2383_v33, %v1087_v10  ;;  %1674 = vst.msk [vmem:[%s2400_s25 + $0x10] sm:$0xf] %vm1669_vm3, %v1545_v6  ;;  %v930_v16 = vadd.f32 %v2383_v33, %v929_v14 }
  0xb7   : > { %1706 = vst.msk [vmem:[%s2400_s25 + $0x90] sm:$0xf] %vm1669_vm3, %v1577_v8  ;;  %vm1225_vm6 = vcmp.ge.f32.partialorder %v1008_v11, 0.0  ;;  %v1353_v17 = vmul.f32 0.1, %v1008_v11  ;;  %vm1162_vm8 = vcmp.ge.f32.partialorder %v850_v15, 0.0 }
  0xb8   : > { %vm1257_vm7 = vcmp.ge.f32.partialorder %v1088_v12, 0.0  ;;  %v1385_v18 = vmul.f32 0.1, %v1088_v12  ;;  %v1290_v19 = vmul.f32 0.1, %v850_v15  ;;  %vm1194_vm9 = vcmp.ge.f32.partialorder %v930_v16, 0.0 }
  0xb9   : > { %v1481_v20 = vsel %vm1225_vm6, %v1008_v11, %v1353_v17  ;;  %v1322_v21 = vmul.f32 0.1, %v930_v16 }
  0xba   : > { %v1609_v22 = vpack.c.bf16 %v1481_v20, %v1481_v20  ;;  %v1513_v23 = vsel %vm1257_vm7, %v1088_v12, %v1385_v18  ;;  %v1418_v24 = vsel %vm1162_vm8, %v850_v15, %v1290_v19  ;;  %v2201_v12 = vld [vmem:[%s2314_s20 + $0x60] sm:$0xff] }
  0xbb   : > { %v1641_v25 = vpack.c.bf16 %v1513_v23, %v1513_v23  ;;  %v1546_v26 = vpack.c.bf16 %v1418_v24, %v1418_v24  ;;  %v1450_v27 = vsel %vm1194_vm9, %v930_v16, %v1322_v21  ;;  %v2233_v18 = vld [vmem:[%s2314_s20 + $0x160] sm:$0xff] }
  0xbc   : > { %1738 = vst.msk [vmem:[%s2400_s25 + $0x110] sm:$0xf] %vm1669_vm3, %v1609_v22  ;;  %v1578_v28 = vpack.c.bf16 %v1450_v27, %v1450_v27  ;;  %v1009_v29 = vpop.f32.mrf.mxu2  ;;  %v852_v36 = vpop.f32.mrf.mxu0  ;;  %v2249_v19 = vld [vmem:[%s2314_s20 + $0x1e0] sm:$0xff] }
  0xbd   : > { %v1089_v30 = vpop.f32.mrf.mxu3  ;;  %1770 = vst.msk [vmem:[%s2400_s25 + $0x190] sm:$0xf] %vm1669_vm3, %v1641_v25  ;;  %v1010_v34 = vadd.f32 %v2383_v33, %v1009_v29  ;;  %v932_v37 = vpop.f32.mrf.mxu1  ;;  %v853_v40 = vadd.f32 %v2383_v33, %v852_v36 }
  0xbe   : > { %v1090_v35 = vadd.f32 %v2383_v33, %v1089_v30  ;;  %1675 = vst.msk [vmem:[%s2400_s25 + $0x14] sm:$0xf] %vm1669_vm3, %v1546_v26  ;;  %v933_v41 = vadd.f32 %v2383_v33, %v932_v37 }
  0xbf   : > { %1707 = vst.msk [vmem:[%s2400_s25 + $0x94] sm:$0xf] %vm1669_vm3, %v1578_v28  ;;  %vm1226_vm10 = vcmp.ge.f32.partialorder %v1010_v34, 0.0  ;;  %v1354_v42 = vmul.f32 0.1, %v1010_v34  ;;  %vm1163_vm12 = vcmp.ge.f32.partialorder %v853_v40, 0.0  ;;  %2134 = vmatmul.msk.bf16.gmra.mxu0 %vm635_vm0, %v2200_v31 }
  0xc0   : > { %vm1258_vm11 = vcmp.ge.f32.partialorder %v1090_v35, 0.0  ;;  %v1386_v43 = vmul.f32 0.1, %v1090_v35  ;;  %v1291_v44 = vmul.f32 0.1, %v853_v40  ;;  %vm1195_vm13 = vcmp.ge.f32.partialorder %v933_v41, 0.0  ;;  %2150 = vmatmul.msk.bf16.gmra.mxu1 %vm635_vm0, %v2216_v32 }
  0xc1   : > { %v1482_v45 = vsel %vm1226_vm10, %v1010_v34, %v1354_v42  ;;  %v1323_v46 = vmul.f32 0.1, %v933_v41  ;;  %2166 = vmatmul.msk.bf16.gmra.mxu2 %vm635_vm0, %v2232_v38 }
  0xc2   : > { %2182 = vmatmul.msk.bf16.gmra.mxu3 %vm635_vm0, %v2248_v39  ;;  %v1610_v47 = vpack.c.bf16 %v1482_v45, %v1482_v45  ;;  %v1514_v48 = vsel %vm1258_vm11, %v1090_v35, %v1386_v43  ;;  %v1419_v49 = vsel %vm1163_vm12, %v853_v40, %v1291_v44 }
  0xc3   : > { %v1642_v50 = vpack.c.bf16 %v1514_v48, %v1514_v48  ;;  %v1547_v51 = vpack.c.bf16 %v1419_v49, %v1419_v49  ;;  %v1451_v52 = vsel %vm1195_vm13, %v933_v41, %v1323_v46 }
  0xc4   : > { %1739 = vst.msk [vmem:[%s2400_s25 + $0x114] sm:$0xf] %vm1669_vm3, %v1610_v47  ;;  %v1579_v53 = vpack.c.bf16 %v1451_v52, %v1451_v52  ;;  %v1012_v54 = vpop.f32.mrf.mxu2  ;;  %v854_v58 = vpop.f32.mrf.mxu0 }
  0xc5   : > { %v1092_v55 = vpop.f32.mrf.mxu3  ;;  %1771 = vst.msk [vmem:[%s2400_s25 + $0x194] sm:$0xf] %vm1669_vm3, %v1642_v50  ;;  %v1013_v56 = vadd.f32 %v2383_v33, %v1012_v54  ;;  %v934_v59 = vpop.f32.mrf.mxu1  ;;  %v855_v60 = vadd.f32 %v2383_v33, %v854_v58  ;;  %v2218_v58 = vld [vmem:[%s2314_s20 + $0xe8] sm:$0xff] }
  0xc6   : > { %v1093_v57 = vadd.f32 %v2383_v33, %v1092_v55  ;;  %1676 = vst.msk [vmem:[%s2400_s25 + $0x18] sm:$0xf] %vm1669_vm3, %v1547_v51  ;;  %v935_v61 = vadd.f32 %v2383_v33, %v934_v59 }
  0xc7   : > { %1708 = vst.msk [vmem:[%s2400_s25 + $0x98] sm:$0xf] %vm1669_vm3, %v1579_v53  ;;  %vm1227_vm14 = vcmp.ge.f32.partialorder %v1013_v56, 0.0  ;;  %v1355_v62 = vmul.f32 0.1, %v1013_v56  ;;  %vm1164_vm1 = vcmp.ge.f32.partialorder %v855_v60, 0.0 }
  0xc8   : > { %vm1259_vm15 = vcmp.ge.f32.partialorder %v1093_v57, 0.0  ;;  %v1387_v63 = vmul.f32 0.1, %v1093_v57  ;;  %v1292_v0 = vmul.f32 0.1, %v855_v60  ;;  %vm1196_vm2 = vcmp.ge.f32.partialorder %v935_v61, 0.0 }
  0xc9   : > { %v1483_v1 = vsel %vm1227_vm14, %v1013_v56, %v1355_v62  ;;  %v1324_v2 = vmul.f32 0.1, %v935_v61 }
  0xca   : > { %v1611_v3 = vpack.c.bf16 %v1483_v1, %v1483_v1  ;;  %v1515_v4 = vsel %vm1259_vm15, %v1093_v57, %v1387_v63  ;;  %v1420_v5 = vsel %vm1164_vm1, %v855_v60, %v1292_v0  ;;  %v2202_v57 = vld [vmem:[%s2314_s20 + $0x68] sm:$0xff] }
  0xcb   : > { %v1643_v6 = vpack.c.bf16 %v1515_v4, %v1515_v4  ;;  %v1548_v7 = vpack.c.bf16 %v1420_v5, %v1420_v5  ;;  %v1452_v8 = vsel %vm1196_vm2, %v935_v61, %v1324_v2  ;;  %v2234_v63 = vld [vmem:[%s2314_s20 + $0x168] sm:$0xff] }
  0xcc   : > { %1740 = vst.msk [vmem:[%s2400_s25 + $0x118] sm:$0xf] %vm1669_vm3, %v1611_v3  ;;  %v1580_v9 = vpack.c.bf16 %v1452_v8, %v1452_v8  ;;  %v1014_v10 = vpop.f32.mrf.mxu2  ;;  %v857_v16 = vpop.f32.mrf.mxu0  ;;  %v2250_v0 = vld [vmem:[%s2314_s20 + $0x1e8] sm:$0xff] }
  0xcd   : > { %v1094_v11 = vpop.f32.mrf.mxu3  ;;  %1772 = vst.msk [vmem:[%s2400_s25 + $0x198] sm:$0xf] %vm1669_vm3, %v1643_v6  ;;  %v1015_v14 = vadd.f32 %v2383_v33, %v1014_v10  ;;  %v937_v17 = vpop.f32.mrf.mxu1  ;;  %v858_v20 = vadd.f32 %v2383_v33, %v857_v16 }
  0xce   : > { %v1095_v15 = vadd.f32 %v2383_v33, %v1094_v11  ;;  %1677 = vst.msk [vmem:[%s2400_s25 + $0x1c] sm:$0xf] %vm1669_vm3, %v1548_v7  ;;  %v938_v21 = vadd.f32 %v2383_v33, %v937_v17 }
  0xcf   : > { %1709 = vst.msk [vmem:[%s2400_s25 + $0x9c] sm:$0xf] %vm1669_vm3, %v1580_v9  ;;  %vm1228_vm4 = vcmp.ge.f32.partialorder %v1015_v14, 0.0  ;;  %v1356_v22 = vmul.f32 0.1, %v1015_v14  ;;  %vm1165_vm6 = vcmp.ge.f32.partialorder %v858_v20, 0.0  ;;  %2135 = vmatmul.msk.bf16.gmra.mxu0 %vm635_vm0, %v2201_v12 }
  0xd0   : > { %vm1260_vm5 = vcmp.ge.f32.partialorder %v1095_v15, 0.0  ;;  %v1388_v23 = vmul.f32 0.1, %v1095_v15  ;;  %v1293_v24 = vmul.f32 0.1, %v858_v20  ;;  %vm1197_vm7 = vcmp.ge.f32.partialorder %v938_v21, 0.0  ;;  %2151 = vmatmul.msk.bf16.gmra.mxu1 %vm635_vm0, %v2217_v13 }
  0xd1   : > { %v1484_v25 = vsel %vm1228_vm4, %v1015_v14, %v1356_v22  ;;  %v1325_v26 = vmul.f32 0.1, %v938_v21  ;;  %2167 = vmatmul.msk.bf16.gmra.mxu2 %vm635_vm0, %v2233_v18 }
  0xd2   : > { %2183 = vmatmul.msk.bf16.gmra.mxu3 %vm635_vm0, %v2249_v19  ;;  %v1612_v27 = vpack.c.bf16 %v1484_v25, %v1484_v25  ;;  %v1516_v28 = vsel %vm1260_vm5, %v1095_v15, %v1388_v23  ;;  %v1421_v29 = vsel %vm1165_vm6, %v858_v20, %v1293_v24 }
  0xd3   : > { %v1644_v30 = vpack.c.bf16 %v1516_v28, %v1516_v28  ;;  %v1549_v31 = vpack.c.bf16 %v1421_v29, %v1421_v29  ;;  %v1453_v32 = vsel %vm1197_vm7, %v938_v21, %v1325_v26 }
  0xd4   : > { %1741 = vst.msk [vmem:[%s2400_s25 + $0x11c] sm:$0xf] %vm1669_vm3, %v1612_v27  ;;  %v1581_v34 = vpack.c.bf16 %v1453_v32, %v1453_v32  ;;  %v1017_v35 = vpop.f32.mrf.mxu2  ;;  %v859_v39 = vpop.f32.mrf.mxu0 }
  0xd5   : > { %v1097_v36 = vpop.f32.mrf.mxu3  ;;  %1773 = vst.msk [vmem:[%s2400_s25 + $0x19c] sm:$0xf] %vm1669_vm3, %v1644_v30  ;;  %v1018_v37 = vadd.f32 %v2383_v33, %v1017_v35  ;;  %v939_v40 = vpop.f32.mrf.mxu1  ;;  %v860_v41 = vadd.f32 %v2383_v33, %v859_v39  ;;  %v2219_v39 = vld [vmem:[%s2314_s20 + $0xf0] sm:$0xff] }
  0xd6   : > { %v1098_v38 = vadd.f32 %v2383_v33, %v1097_v36  ;;  %1678 = vst.msk [vmem:[%s2400_s25 + $0x20] sm:$0xf] %vm1669_vm3, %v1549_v31  ;;  %v940_v42 = vadd.f32 %v2383_v33, %v939_v40 }
  0xd7   : > { %1710 = vst.msk [vmem:[%s2400_s25 + $0xa0] sm:$0xf] %vm1669_vm3, %v1581_v34  ;;  %vm1229_vm8 = vcmp.ge.f32.partialorder %v1018_v37, 0.0  ;;  %v1357_v43 = vmul.f32 0.1, %v1018_v37  ;;  %vm1166_vm10 = vcmp.ge.f32.partialorder %v860_v41, 0.0 }
  0xd8   : > { %vm1261_vm9 = vcmp.ge.f32.partialorder %v1098_v38, 0.0  ;;  %v1389_v44 = vmul.f32 0.1, %v1098_v38  ;;  %v1294_v45 = vmul.f32 0.1, %v860_v41  ;;  %vm1198_vm11 = vcmp.ge.f32.partialorder %v940_v42, 0.0 }
  0xd9   : > { %v1485_v46 = vsel %vm1229_vm8, %v1018_v37, %v1357_v43  ;;  %v1326_v47 = vmul.f32 0.1, %v940_v42 }
  0xda   : > { %v1613_v48 = vpack.c.bf16 %v1485_v46, %v1485_v46  ;;  %v1517_v49 = vsel %vm1261_vm9, %v1098_v38, %v1389_v44  ;;  %v1422_v50 = vsel %vm1166_vm10, %v860_v41, %v1294_v45  ;;  %v2203_v38 = vld [vmem:[%s2314_s20 + $0x70] sm:$0xff] }
  0xdb   : > { %v1645_v51 = vpack.c.bf16 %v1517_v49, %v1517_v49  ;;  %v1550_v52 = vpack.c.bf16 %v1422_v50, %v1422_v50  ;;  %v1454_v53 = vsel %vm1198_vm11, %v940_v42, %v1326_v47  ;;  %v2235_v44 = vld [vmem:[%s2314_s20 + $0x170] sm:$0xff] }
  0xdc   : > { %1742 = vst.msk [vmem:[%s2400_s25 + $0x120] sm:$0xf] %vm1669_vm3, %v1613_v48  ;;  %v1582_v54 = vpack.c.bf16 %v1454_v53, %v1454_v53  ;;  %v1019_v55 = vpop.f32.mrf.mxu2  ;;  %v862_v61 = vpop.f32.mrf.mxu0  ;;  %v2251_v45 = vld [vmem:[%s2314_s20 + $0x1f0] sm:$0xff] }
  0xdd   : > { %v1099_v56 = vpop.f32.mrf.mxu3  ;;  %1774 = vst.msk [vmem:[%s2400_s25 + $0x1a0] sm:$0xf] %vm1669_vm3, %v1645_v51  ;;  %v1020_v59 = vadd.f32 %v2383_v33, %v1019_v55  ;;  %v942_v62 = vpop.f32.mrf.mxu1  ;;  %v863_v1 = vadd.f32 %v2383_v33, %v862_v61 }
  0xde   : > { %v1100_v60 = vadd.f32 %v2383_v33, %v1099_v56  ;;  %1679 = vst.msk [vmem:[%s2400_s25 + $0x24] sm:$0xf] %vm1669_vm3, %v1550_v52  ;;  %v943_v2 = vadd.f32 %v2383_v33, %v942_v62 }
  0xdf   : > { %1711 = vst.msk [vmem:[%s2400_s25 + $0xa4] sm:$0xf] %vm1669_vm3, %v1582_v54  ;;  %vm1230_vm12 = vcmp.ge.f32.partialorder %v1020_v59, 0.0  ;;  %v1358_v3 = vmul.f32 0.1, %v1020_v59  ;;  %vm1167_vm14 = vcmp.ge.f32.partialorder %v863_v1, 0.0  ;;  %2136 = vmatmul.msk.bf16.gmra.mxu0 %vm635_vm0, %v2202_v57 }
  0xe0   : > { %vm1262_vm13 = vcmp.ge.f32.partialorder %v1100_v60, 0.0  ;;  %v1390_v4 = vmul.f32 0.1, %v1100_v60  ;;  %v1295_v5 = vmul.f32 0.1, %v863_v1  ;;  %vm1199_vm15 = vcmp.ge.f32.partialorder %v943_v2, 0.0  ;;  %2152 = vmatmul.msk.bf16.gmra.mxu1 %vm635_vm0, %v2218_v58 }
  0xe1   : > { %v1486_v6 = vsel %vm1230_vm12, %v1020_v59, %v1358_v3  ;;  %v1327_v7 = vmul.f32 0.1, %v943_v2  ;;  %2168 = vmatmul.msk.bf16.gmra.mxu2 %vm635_vm0, %v2234_v63 }
  0xe2   : > { %2184 = vmatmul.msk.bf16.gmra.mxu3 %vm635_vm0, %v2250_v0  ;;  %v1614_v8 = vpack.c.bf16 %v1486_v6, %v1486_v6  ;;  %v1518_v9 = vsel %vm1262_vm13, %v1100_v60, %v1390_v4  ;;  %v1423_v10 = vsel %vm1167_vm14, %v863_v1, %v1295_v5 }
  0xe3   : > { %v1646_v11 = vpack.c.bf16 %v1518_v9, %v1518_v9  ;;  %v1551_v12 = vpack.c.bf16 %v1423_v10, %v1423_v10  ;;  %v1455_v13 = vsel %vm1199_vm15, %v943_v2, %v1327_v7 }
  0xe4   : > { %1743 = vst.msk [vmem:[%s2400_s25 + $0x124] sm:$0xf] %vm1669_vm3, %v1614_v8  ;;  %v1583_v14 = vpack.c.bf16 %v1455_v13, %v1455_v13  ;;  %v1022_v15 = vpop.f32.mrf.mxu2  ;;  %v864_v19 = vpop.f32.mrf.mxu0 }
  0xe5   : > { %v1102_v16 = vpop.f32.mrf.mxu3  ;;  %1775 = vst.msk [vmem:[%s2400_s25 + $0x1a4] sm:$0xf] %vm1669_vm3, %v1646_v11  ;;  %v1023_v17 = vadd.f32 %v2383_v33, %v1022_v15  ;;  %v944_v20 = vpop.f32.mrf.mxu1  ;;  %v865_v21 = vadd.f32 %v2383_v33, %v864_v19  ;;  %v2220_v19 = vld [vmem:[%s2314_s20 + $0xf8] sm:$0xff] }
  0xe6   : > { %v1103_v18 = vadd.f32 %v2383_v33, %v1102_v16  ;;  %1680 = vst.msk [vmem:[%s2400_s25 + $0x28] sm:$0xf] %vm1669_vm3, %v1551_v12  ;;  %v945_v22 = vadd.f32 %v2383_v33, %v944_v20 }
  0xe7   : > { %1712 = vst.msk [vmem:[%s2400_s25 + $0xa8] sm:$0xf] %vm1669_vm3, %v1583_v14  ;;  %vm1231_vm1 = vcmp.ge.f32.partialorder %v1023_v17, 0.0  ;;  %v1359_v23 = vmul.f32 0.1, %v1023_v17  ;;  %vm1168_vm4 = vcmp.ge.f32.partialorder %v865_v21, 0.0 }
  0xe8   : > { %vm1263_vm2 = vcmp.ge.f32.partialorder %v1103_v18, 0.0  ;;  %v1391_v24 = vmul.f32 0.1, %v1103_v18  ;;  %v1296_v25 = vmul.f32 0.1, %v865_v21  ;;  %vm1200_vm5 = vcmp.ge.f32.partialorder %v945_v22, 0.0 }
  0xe9   : > { %v1487_v26 = vsel %vm1231_vm1, %v1023_v17, %v1359_v23  ;;  %v1328_v27 = vmul.f32 0.1, %v945_v22 }
  0xea   : > { %v1615_v28 = vpack.c.bf16 %v1487_v26, %v1487_v26  ;;  %v1519_v29 = vsel %vm1263_vm2, %v1103_v18, %v1391_v24  ;;  %v1424_v30 = vsel %vm1168_vm4, %v865_v21, %v1296_v25  ;;  %v2204_v18 = vld [vmem:[%s2314_s20 + $0x78] sm:$0xff] }
  0xeb   : > { %v1647_v31 = vpack.c.bf16 %v1519_v29, %v1519_v29  ;;  %v1552_v32 = vpack.c.bf16 %v1424_v30, %v1424_v30  ;;  %v1456_v34 = vsel %vm1200_vm5, %v945_v22, %v1328_v27  ;;  %v2236_v24 = vld [vmem:[%s2314_s20 + $0x178] sm:$0xff] }
  0xec   : > { %1744 = vst.msk [vmem:[%s2400_s25 + $0x128] sm:$0xf] %vm1669_vm3, %v1615_v28  ;;  %v1584_v35 = vpack.c.bf16 %v1456_v34, %v1456_v34  ;;  %v1024_v36 = vpop.f32.mrf.mxu2  ;;  %v867_v42 = vpop.f32.mrf.mxu0  ;;  %v2252_v25 = vld [vmem:[%s2314_s20 + $0x1f8] sm:$0xff] }
  0xed   : > { %v1104_v37 = vpop.f32.mrf.mxu3  ;;  %1776 = vst.msk [vmem:[%s2400_s25 + $0x1a8] sm:$0xf] %vm1669_vm3, %v1647_v31  ;;  %v1025_v40 = vadd.f32 %v2383_v33, %v1024_v36  ;;  %v947_v43 = vpop.f32.mrf.mxu1  ;;  %v868_v46 = vadd.f32 %v2383_v33, %v867_v42 }
  0xee   : > { %v1105_v41 = vadd.f32 %v2383_v33, %v1104_v37  ;;  %1681 = vst.msk [vmem:[%s2400_s25 + $0x2c] sm:$0xf] %vm1669_vm3, %v1552_v32  ;;  %v948_v47 = vadd.f32 %v2383_v33, %v947_v43 }
  0xef   : > { %1713 = vst.msk [vmem:[%s2400_s25 + $0xac] sm:$0xf] %vm1669_vm3, %v1584_v35  ;;  %vm1232_vm6 = vcmp.ge.f32.partialorder %v1025_v40, 0.0  ;;  %v1360_v48 = vmul.f32 0.1, %v1025_v40  ;;  %vm1169_vm8 = vcmp.ge.f32.partialorder %v868_v46, 0.0  ;;  %2137 = vmatmul.msk.bf16.gmra.mxu0 %vm635_vm0, %v2203_v38 }
  0xf0   : > { %vm1264_vm7 = vcmp.ge.f32.partialorder %v1105_v41, 0.0  ;;  %v1392_v49 = vmul.f32 0.1, %v1105_v41  ;;  %v1297_v50 = vmul.f32 0.1, %v868_v46  ;;  %vm1201_vm9 = vcmp.ge.f32.partialorder %v948_v47, 0.0  ;;  %2153 = vmatmul.msk.bf16.gmra.mxu1 %vm635_vm0, %v2219_v39 }
  0xf1   : > { %v1488_v51 = vsel %vm1232_vm6, %v1025_v40, %v1360_v48  ;;  %v1329_v52 = vmul.f32 0.1, %v948_v47  ;;  %2169 = vmatmul.msk.bf16.gmra.mxu2 %vm635_vm0, %v2235_v44 }
  0xf2   : > { %2185 = vmatmul.msk.bf16.gmra.mxu3 %vm635_vm0, %v2251_v45  ;;  %v1616_v53 = vpack.c.bf16 %v1488_v51, %v1488_v51  ;;  %v1520_v54 = vsel %vm1264_vm7, %v1105_v41, %v1392_v49  ;;  %v1425_v55 = vsel %vm1169_vm8, %v868_v46, %v1297_v50 }
  0xf3   : > { %v1648_v56 = vpack.c.bf16 %v1520_v54, %v1520_v54  ;;  %v1553_v57 = vpack.c.bf16 %v1425_v55, %v1425_v55  ;;  %v1457_v58 = vsel %vm1201_vm9, %v948_v47, %v1329_v52 }
  0xf4   : > { %1745 = vst.msk [vmem:[%s2400_s25 + $0x12c] sm:$0xf] %vm1669_vm3, %v1616_v53  ;;  %v1585_v59 = vpack.c.bf16 %v1457_v58, %v1457_v58  ;;  %v1027_v60 = vpop.f32.mrf.mxu2  ;;  %v869_v0 = vpop.f32.mrf.mxu0 }
  0xf5   : > { %v1107_v61 = vpop.f32.mrf.mxu3  ;;  %1777 = vst.msk [vmem:[%s2400_s25 + $0x1ac] sm:$0xf] %vm1669_vm3, %v1648_v56  ;;  %v1028_v62 = vadd.f32 %v2383_v33, %v1027_v60  ;;  %v949_v1 = vpop.f32.mrf.mxu1  ;;  %v870_v2 = vadd.f32 %v2383_v33, %v869_v0 }
  0xf6   : > { %v1108_v63 = vadd.f32 %v2383_v33, %v1107_v61  ;;  %1682 = vst.msk [vmem:[%s2400_s25 + $0x30] sm:$0xf] %vm1669_vm3, %v1553_v57  ;;  %v950_v3 = vadd.f32 %v2383_v33, %v949_v1 }
  0xf7   : > { %1714 = vst.msk [vmem:[%s2400_s25 + $0xb0] sm:$0xf] %vm1669_vm3, %v1585_v59  ;;  %vm1233_vm10 = vcmp.ge.f32.partialorder %v1028_v62, 0.0  ;;  %v1361_v4 = vmul.f32 0.1, %v1028_v62  ;;  %vm1170_vm12 = vcmp.ge.f32.partialorder %v870_v2, 0.0 }
  0xf8   : > { %vm1265_vm11 = vcmp.ge.f32.partialorder %v1108_v63, 0.0  ;;  %v1393_v5 = vmul.f32 0.1, %v1108_v63  ;;  %v1298_v6 = vmul.f32 0.1, %v870_v2  ;;  %vm1202_vm13 = vcmp.ge.f32.partialorder %v950_v3, 0.0 }
  0xf9   : > { %v1489_v7 = vsel %vm1233_vm10, %v1028_v62, %v1361_v4  ;;  %v1330_v8 = vmul.f32 0.1, %v950_v3 }
  0xfa   : > { %v1617_v9 = vpack.c.bf16 %v1489_v7, %v1489_v7  ;;  %v1521_v10 = vsel %vm1265_vm11, %v1108_v63, %v1393_v5  ;;  %v1426_v11 = vsel %vm1170_vm12, %v870_v2, %v1298_v6 }
  0xfb   : > { %v1649_v12 = vpack.c.bf16 %v1521_v10, %v1521_v10  ;;  %v1554_v13 = vpack.c.bf16 %v1426_v11, %v1426_v11  ;;  %v1458_v14 = vsel %vm1202_vm13, %v950_v3, %v1330_v8 }
  0xfc   : > { %1746 = vst.msk [vmem:[%s2400_s25 + $0x130] sm:$0xf] %vm1669_vm3, %v1617_v9  ;;  %v1586_v15 = vpack.c.bf16 %v1458_v14, %v1458_v14  ;;  %v1029_v16 = vpop.f32.mrf.mxu2  ;;  %v872_v22 = vpop.f32.mrf.mxu0 }
  0xfd   : > { %v1109_v17 = vpop.f32.mrf.mxu3  ;;  %1778 = vst.msk [vmem:[%s2400_s25 + $0x1b0] sm:$0xf] %vm1669_vm3, %v1649_v12  ;;  %v1030_v20 = vadd.f32 %v2383_v33, %v1029_v16  ;;  %v952_v23 = vpop.f32.mrf.mxu1  ;;  %v873_v26 = vadd.f32 %v2383_v33, %v872_v22 }
  0xfe   : > { %v1110_v21 = vadd.f32 %v2383_v33, %v1109_v17  ;;  %1683 = vst.msk [vmem:[%s2400_s25 + $0x34] sm:$0xf] %vm1669_vm3, %v1554_v13  ;;  %v953_v27 = vadd.f32 %v2383_v33, %v952_v23 }
  0xff   : > { %1715 = vst.msk [vmem:[%s2400_s25 + $0xb4] sm:$0xf] %vm1669_vm3, %v1586_v15  ;;  %vm1234_vm14 = vcmp.ge.f32.partialorder %v1030_v20, 0.0  ;;  %v1362_v28 = vmul.f32 0.1, %v1030_v20  ;;  %vm1171_vm1 = vcmp.ge.f32.partialorder %v873_v26, 0.0  ;;  %2138 = vmatmul.msk.bf16.gmra.mxu0 %vm635_vm0, %v2204_v18 }
 0x100   : > { %vm1266_vm15 = vcmp.ge.f32.partialorder %v1110_v21, 0.0  ;;  %v1394_v29 = vmul.f32 0.1, %v1110_v21  ;;  %v1299_v30 = vmul.f32 0.1, %v873_v26  ;;  %vm1203_vm2 = vcmp.ge.f32.partialorder %v953_v27, 0.0  ;;  %2154 = vmatmul.msk.bf16.gmra.mxu1 %vm635_vm0, %v2220_v19 }
 0x101   : > { %v1490_v31 = vsel %vm1234_vm14, %v1030_v20, %v1362_v28  ;;  %v1331_v32 = vmul.f32 0.1, %v953_v27  ;;  %2170 = vmatmul.msk.bf16.gmra.mxu2 %vm635_vm0, %v2236_v24  ;;  %v2653_v18 = vld [vmem:[%s2850_s2] ss:$0 sm:$0xff] }
 0x102   : > { %2186 = vmatmul.msk.bf16.gmra.mxu3 %vm635_vm0, %v2252_v25  ;;  %v1618_v34 = vpack.c.bf16 %v1490_v31, %v1490_v31  ;;  %v1522_v35 = vsel %vm1266_vm15, %v1110_v21, %v1394_v29  ;;  %v1427_v36 = vsel %vm1171_vm1, %v873_v26, %v1299_v30 }
 0x103   : > { %v1650_v37 = vpack.c.bf16 %v1522_v35, %v1522_v35  ;;  %v1555_v38 = vpack.c.bf16 %v1427_v36, %v1427_v36  ;;  %v1459_v39 = vsel %vm1203_vm2, %v953_v27, %v1331_v32 }
 0x104   : > { %1747 = vst.msk [vmem:[%s2400_s25 + $0x134] sm:$0xf] %vm1669_vm3, %v1618_v34  ;;  %v1587_v40 = vpack.c.bf16 %v1459_v39, %v1459_v39  ;;  %v1032_v41 = vpop.f32.mrf.mxu2  ;;  %v874_v45 = vpop.f32.mrf.mxu0 }
 0x105   : > { %v1112_v42 = vpop.f32.mrf.mxu3  ;;  %1779 = vst.msk [vmem:[%s2400_s25 + $0x1b4] sm:$0xf] %vm1669_vm3, %v1650_v37  ;;  %v1033_v43 = vadd.f32 %v2383_v33, %v1032_v41  ;;  %v954_v46 = vpop.f32.mrf.mxu1  ;;  %v875_v47 = vadd.f32 %v2383_v33, %v874_v45 }
 0x106   : > { %v1113_v44 = vadd.f32 %v2383_v33, %v1112_v42  ;;  %1684 = vst.msk [vmem:[%s2400_s25 + $0x38] sm:$0xf] %vm1669_vm3, %v1555_v38  ;;  %v955_v48 = vadd.f32 %v2383_v33, %v954_v46 }
 0x107   : > { %1716 = vst.msk [vmem:[%s2400_s25 + $0xb8] sm:$0xf] %vm1669_vm3, %v1587_v40  ;;  %vm1235_vm0 = vcmp.ge.f32.partialorder %v1033_v43, 0.0  ;;  %v1363_v49 = vmul.f32 0.1, %v1033_v43  ;;  %vm1172_vm5 = vcmp.ge.f32.partialorder %v875_v47, 0.0 }
 0x108   : > { %vm1267_vm4 = vcmp.ge.f32.partialorder %v1113_v44, 0.0  ;;  %v1395_v50 = vmul.f32 0.1, %v1113_v44  ;;  %v1300_v51 = vmul.f32 0.1, %v875_v47  ;;  %vm1204_vm6 = vcmp.ge.f32.partialorder %v955_v48, 0.0 }
 0x109   : > { %v1491_v52 = vsel %vm1235_vm0, %v1033_v43, %v1363_v49  ;;  %v1332_v53 = vmul.f32 0.1, %v955_v48 }
 0x10a   : > { %v1619_v54 = vpack.c.bf16 %v1491_v52, %v1491_v52  ;;  %v1523_v55 = vsel %vm1267_vm4, %v1113_v44, %v1395_v50  ;;  %v1428_v56 = vsel %vm1172_vm5, %v875_v47, %v1300_v51 }
 0x10b   : > { %v1651_v57 = vpack.c.bf16 %v1523_v55, %v1523_v55  ;;  %v1556_v58 = vpack.c.bf16 %v1428_v56, %v1428_v56  ;;  %v1460_v59 = vsel %vm1204_vm6, %v955_v48, %v1332_v53 }
 0x10c   : > { %1748 = vst.msk [vmem:[%s2400_s25 + $0x138] sm:$0xf] %vm1669_vm3, %v1619_v54  ;;  %v1588_v60 = vpack.c.bf16 %v1460_v59, %v1460_v59  ;;  %v1034_v61 = vpop.f32.mrf.mxu2  ;;  %v877_v1 = vpop.f32.mrf.mxu0 }
 0x10d   : > { %v1114_v62 = vpop.f32.mrf.mxu3  ;;  %1780 = vst.msk [vmem:[%s2400_s25 + $0x1b8] sm:$0xf] %vm1669_vm3, %v1651_v57  ;;  %v1035_v63 = vadd.f32 %v2383_v33, %v1034_v61  ;;  %v957_v2 = vpop.f32.mrf.mxu1  ;;  %v878_v3 = vadd.f32 %v2383_v33, %v877_v1 }
 0x10e   : > { %v1115_v0 = vadd.f32 %v2383_v33, %v1114_v62  ;;  %1685 = vst.msk [vmem:[%s2400_s25 + $0x3c] sm:$0xf] %vm1669_vm3, %v1556_v58  ;;  %v958_v4 = vadd.f32 %v2383_v33, %v957_v2 }
 0x10f   : > { %1717 = vst.msk [vmem:[%s2400_s25 + $0xbc] sm:$0xf] %vm1669_vm3, %v1588_v60  ;;  %vm1236_vm7 = vcmp.ge.f32.partialorder %v1035_v63, 0.0  ;;  %v1364_v5 = vmul.f32 0.1, %v1035_v63  ;;  %vm1173_vm9 = vcmp.ge.f32.partialorder %v878_v3, 0.0 }
 0x110   : > { %vm1268_vm8 = vcmp.ge.f32.partialorder %v1115_v0, 0.0  ;;  %v1396_v6 = vmul.f32 0.1, %v1115_v0  ;;  %v1301_v7 = vmul.f32 0.1, %v878_v3  ;;  %vm1205_vm10 = vcmp.ge.f32.partialorder %v958_v4, 0.0 }
 0x111   : > { %v1492_v8 = vsel %vm1236_vm7, %v1035_v63, %v1364_v5  ;;  %v1333_v9 = vmul.f32 0.1, %v958_v4 }
 0x112   : > { %v1620_v10 = vpack.c.bf16 %v1492_v8, %v1492_v8  ;;  %v1524_v11 = vsel %vm1268_vm8, %v1115_v0, %v1396_v6  ;;  %v1429_v12 = vsel %vm1173_vm9, %v878_v3, %v1301_v7 }
 0x113   : > { %v1652_v13 = vpack.c.bf16 %v1524_v11, %v1524_v11  ;;  %v1557_v33 = vpack.c.bf16 %v1429_v12, %v1429_v12  ;;  %v1461_v14 = vsel %vm1205_vm10, %v958_v4, %v1333_v9 }
 0x114   : > { %1749 = vst.msk [vmem:[%s2400_s25 + $0x13c] sm:$0xf] %vm1669_vm3, %v1620_v10  ;;  %v1589_v15 = vpack.c.bf16 %v1461_v14, %v1461_v14  ;;  %v1037_v16 = vpop.f32.mrf.mxu2  ;;  %v879_v21 = vpop.f32.mrf.mxu0 }
 0x115   : > { %v1117_v17 = vpop.f32.mrf.mxu3  ;;  %1781 = vst.msk [vmem:[%s2400_s25 + $0x1bc] sm:$0xf] %vm1669_vm3, %v1652_v13  ;;  %v1038_v19 = vadd.f32 %v2653_v18, %v1037_v16  ;;  %v959_v22 = vpop.f32.mrf.mxu1  ;;  %v880_v23 = vadd.f32 %v2653_v18, %v879_v21 }
 0x116   : > { %v1118_v20 = vadd.f32 %v2653_v18, %v1117_v17  ;;  %1686 = vst.msk [vmem:[%s2400_s25 + $0x40] sm:$0xf] %vm1669_vm3, %v1557_v33  ;;  %v960_v24 = vadd.f32 %v2653_v18, %v959_v22 }
 0x117   : > { %1718 = vst.msk [vmem:[%s2400_s25 + $0xc0] sm:$0xf] %vm1669_vm3, %v1589_v15  ;;  %vm1237_vm11 = vcmp.ge.f32.partialorder %v1038_v19, 0.0  ;;  %v1365_v25 = vmul.f32 0.1, %v1038_v19  ;;  %vm1174_vm13 = vcmp.ge.f32.partialorder %v880_v23, 0.0 }
 0x118   : > { %vm1269_vm12 = vcmp.ge.f32.partialorder %v1118_v20, 0.0  ;;  %v1397_v26 = vmul.f32 0.1, %v1118_v20  ;;  %v1302_v27 = vmul.f32 0.1, %v880_v23  ;;  %vm1206_vm14 = vcmp.ge.f32.partialorder %v960_v24, 0.0 }
 0x119   : > { %v1493_v28 = vsel %vm1237_vm11, %v1038_v19, %v1365_v25  ;;  %v1334_v29 = vmul.f32 0.1, %v960_v24 }
 0x11a   : > { %v1621_v30 = vpack.c.bf16 %v1493_v28, %v1493_v28  ;;  %v1525_v31 = vsel %vm1269_vm12, %v1118_v20, %v1397_v26  ;;  %v1430_v32 = vsel %vm1174_vm13, %v880_v23, %v1302_v27 }
 0x11b   : > { %v1653_v34 = vpack.c.bf16 %v1525_v31, %v1525_v31  ;;  %v1558_v35 = vpack.c.bf16 %v1430_v32, %v1430_v32  ;;  %v1462_v36 = vsel %vm1206_vm14, %v960_v24, %v1334_v29 }
 0x11c   : > { %1750 = vst.msk [vmem:[%s2400_s25 + $0x140] sm:$0xf] %vm1669_vm3, %v1621_v30  ;;  %v1590_v37 = vpack.c.bf16 %v1462_v36, %v1462_v36  ;;  %v1039_v38 = vpop.f32.mrf.mxu2  ;;  %v882_v42 = vpop.f32.mrf.mxu0 }
 0x11d   : > { %v1119_v39 = vpop.f32.mrf.mxu3  ;;  %1782 = vst.msk [vmem:[%s2400_s25 + $0x1c0] sm:$0xf] %vm1669_vm3, %v1653_v34  ;;  %v1040_v40 = vadd.f32 %v2653_v18, %v1039_v38  ;;  %v962_v43 = vpop.f32.mrf.mxu1  ;;  %v883_v44 = vadd.f32 %v2653_v18, %v882_v42 }
 0x11e   : > { %v1120_v41 = vadd.f32 %v2653_v18, %v1119_v39  ;;  %1687 = vst.msk [vmem:[%s2400_s25 + $0x44] sm:$0xf] %vm1669_vm3, %v1558_v35  ;;  %v963_v45 = vadd.f32 %v2653_v18, %v962_v43 }
 0x11f   : > { %1719 = vst.msk [vmem:[%s2400_s25 + $0xc4] sm:$0xf] %vm1669_vm3, %v1590_v37  ;;  %vm1238_vm15 = vcmp.ge.f32.partialorder %v1040_v40, 0.0  ;;  %v1366_v46 = vmul.f32 0.1, %v1040_v40  ;;  %vm1175_vm2 = vcmp.ge.f32.partialorder %v883_v44, 0.0 }
 0x120   : > { %vm1270_vm1 = vcmp.ge.f32.partialorder %v1120_v41, 0.0  ;;  %v1398_v47 = vmul.f32 0.1, %v1120_v41  ;;  %v1303_v48 = vmul.f32 0.1, %v883_v44  ;;  %vm1207_vm0 = vcmp.ge.f32.partialorder %v963_v45, 0.0 }
 0x121   : > { %v1494_v49 = vsel %vm1238_vm15, %v1040_v40, %v1366_v46  ;;  %v1335_v50 = vmul.f32 0.1, %v963_v45 }
 0x122   : > { %v1622_v51 = vpack.c.bf16 %v1494_v49, %v1494_v49  ;;  %v1526_v52 = vsel %vm1270_vm1, %v1120_v41, %v1398_v47  ;;  %v1431_v53 = vsel %vm1175_vm2, %v883_v44, %v1303_v48 }
 0x123   : > { %v1654_v54 = vpack.c.bf16 %v1526_v52, %v1526_v52  ;;  %v1559_v55 = vpack.c.bf16 %v1431_v53, %v1431_v53  ;;  %v1463_v56 = vsel %vm1207_vm0, %v963_v45, %v1335_v50 }
 0x124   : > { %1751 = vst.msk [vmem:[%s2400_s25 + $0x144] sm:$0xf] %vm1669_vm3, %v1622_v51  ;;  %v1591_v57 = vpack.c.bf16 %v1463_v56, %v1463_v56  ;;  %v1042_v58 = vpop.f32.mrf.mxu2  ;;  %v884_v62 = vpop.f32.mrf.mxu0 }
 0x125   : > { %v1122_v59 = vpop.f32.mrf.mxu3  ;;  %1783 = vst.msk [vmem:[%s2400_s25 + $0x1c4] sm:$0xf] %vm1669_vm3, %v1654_v54  ;;  %v1043_v60 = vadd.f32 %v2653_v18, %v1042_v58  ;;  %v964_v63 = vpop.f32.mrf.mxu1  ;;  %v885_v0 = vadd.f32 %v2653_v18, %v884_v62 }
 0x126   : > { %v1123_v61 = vadd.f32 %v2653_v18, %v1122_v59  ;;  %1688 = vst.msk [vmem:[%s2400_s25 + $0x48] sm:$0xf] %vm1669_vm3, %v1559_v55  ;;  %v965_v1 = vadd.f32 %v2653_v18, %v964_v63 }
 0x127   : > { %1720 = vst.msk [vmem:[%s2400_s25 + $0xc8] sm:$0xf] %vm1669_vm3, %v1591_v57  ;;  %vm1239_vm4 = vcmp.ge.f32.partialorder %v1043_v60, 0.0  ;;  %v1367_v2 = vmul.f32 0.1, %v1043_v60  ;;  %vm1176_vm6 = vcmp.ge.f32.partialorder %v885_v0, 0.0 }
 0x128   : > { %vm1271_vm5 = vcmp.ge.f32.partialorder %v1123_v61, 0.0  ;;  %v1399_v3 = vmul.f32 0.1, %v1123_v61  ;;  %v1304_v4 = vmul.f32 0.1, %v885_v0  ;;  %vm1208_vm7 = vcmp.ge.f32.partialorder %v965_v1, 0.0 }
 0x129   : > { %v1495_v5 = vsel %vm1239_vm4, %v1043_v60, %v1367_v2  ;;  %v1336_v6 = vmul.f32 0.1, %v965_v1 }
 0x12a   : > { %v1623_v7 = vpack.c.bf16 %v1495_v5, %v1495_v5  ;;  %v1527_v8 = vsel %vm1271_vm5, %v1123_v61, %v1399_v3  ;;  %v1432_v9 = vsel %vm1176_vm6, %v885_v0, %v1304_v4 }
 0x12b   : > { %v1655_v10 = vpack.c.bf16 %v1527_v8, %v1527_v8  ;;  %v1560_v11 = vpack.c.bf16 %v1432_v9, %v1432_v9  ;;  %v1464_v12 = vsel %vm1208_vm7, %v965_v1, %v1336_v6 }
 0x12c   : > { %1752 = vst.msk [vmem:[%s2400_s25 + $0x148] sm:$0xf] %vm1669_vm3, %v1623_v7  ;;  %v1592_v13 = vpack.c.bf16 %v1464_v12, %v1464_v12  ;;  %v1044_v33 = vpop.f32.mrf.mxu2  ;;  %v887_v17 = vpop.f32.mrf.mxu0 }
 0x12d   : > { %v1124_v14 = vpop.f32.mrf.mxu3  ;;  %1784 = vst.msk [vmem:[%s2400_s25 + $0x1c8] sm:$0xf] %vm1669_vm3, %v1655_v10  ;;  %v1045_v15 = vadd.f32 %v2653_v18, %v1044_v33  ;;  %v967_v19 = vpop.f32.mrf.mxu1  ;;  %v888_v20 = vadd.f32 %v2653_v18, %v887_v17 }
 0x12e   : > { %v1125_v16 = vadd.f32 %v2653_v18, %v1124_v14  ;;  %1689 = vst.msk [vmem:[%s2400_s25 + $0x4c] sm:$0xf] %vm1669_vm3, %v1560_v11  ;;  %v968_v21 = vadd.f32 %v2653_v18, %v967_v19 }
 0x12f   : > { %1721 = vst.msk [vmem:[%s2400_s25 + $0xcc] sm:$0xf] %vm1669_vm3, %v1592_v13  ;;  %vm1240_vm8 = vcmp.ge.f32.partialorder %v1045_v15, 0.0  ;;  %v1368_v22 = vmul.f32 0.1, %v1045_v15  ;;  %vm1177_vm10 = vcmp.ge.f32.partialorder %v888_v20, 0.0 }
 0x130   : > { %vm1272_vm9 = vcmp.ge.f32.partialorder %v1125_v16, 0.0  ;;  %v1400_v23 = vmul.f32 0.1, %v1125_v16  ;;  %v1305_v24 = vmul.f32 0.1, %v888_v20  ;;  %vm1209_vm11 = vcmp.ge.f32.partialorder %v968_v21, 0.0 }
 0x131   : > { %v1496_v25 = vsel %vm1240_vm8, %v1045_v15, %v1368_v22  ;;  %v1337_v26 = vmul.f32 0.1, %v968_v21 }
 0x132   : > { %v1624_v27 = vpack.c.bf16 %v1496_v25, %v1496_v25  ;;  %v1528_v28 = vsel %vm1272_vm9, %v1125_v16, %v1400_v23  ;;  %v1433_v29 = vsel %vm1177_vm10, %v888_v20, %v1305_v24 }
 0x133   : > { %v1656_v30 = vpack.c.bf16 %v1528_v28, %v1528_v28  ;;  %v1561_v31 = vpack.c.bf16 %v1433_v29, %v1433_v29  ;;  %v1465_v32 = vsel %vm1209_vm11, %v968_v21, %v1337_v26 }
 0x134   : > { %1753 = vst.msk [vmem:[%s2400_s25 + $0x14c] sm:$0xf] %vm1669_vm3, %v1624_v27  ;;  %v1593_v34 = vpack.c.bf16 %v1465_v32, %v1465_v32  ;;  %v1047_v35 = vpop.f32.mrf.mxu2  ;;  %v889_v39 = vpop.f32.mrf.mxu0 }
 0x135   : > { %v1127_v36 = vpop.f32.mrf.mxu3  ;;  %1785 = vst.msk [vmem:[%s2400_s25 + $0x1cc] sm:$0xf] %vm1669_vm3, %v1656_v30  ;;  %v1048_v37 = vadd.f32 %v2653_v18, %v1047_v35  ;;  %v969_v40 = vpop.f32.mrf.mxu1  ;;  %v890_v41 = vadd.f32 %v2653_v18, %v889_v39 }
 0x136   : > { %v1128_v38 = vadd.f32 %v2653_v18, %v1127_v36  ;;  %1690 = vst.msk [vmem:[%s2400_s25 + $0x50] sm:$0xf] %vm1669_vm3, %v1561_v31  ;;  %v970_v42 = vadd.f32 %v2653_v18, %v969_v40 }
 0x137   : > { %1722 = vst.msk [vmem:[%s2400_s25 + $0xd0] sm:$0xf] %vm1669_vm3, %v1593_v34  ;;  %vm1241_vm12 = vcmp.ge.f32.partialorder %v1048_v37, 0.0  ;;  %v1369_v43 = vmul.f32 0.1, %v1048_v37  ;;  %vm1178_vm14 = vcmp.ge.f32.partialorder %v890_v41, 0.0 }
 0x138   : > { %vm1273_vm13 = vcmp.ge.f32.partialorder %v1128_v38, 0.0  ;;  %v1401_v44 = vmul.f32 0.1, %v1128_v38  ;;  %v1306_v45 = vmul.f32 0.1, %v890_v41  ;;  %vm1210_vm15 = vcmp.ge.f32.partialorder %v970_v42, 0.0 }
 0x139   : > { %v1497_v46 = vsel %vm1241_vm12, %v1048_v37, %v1369_v43  ;;  %v1338_v47 = vmul.f32 0.1, %v970_v42 }
 0x13a   : > { %v1625_v48 = vpack.c.bf16 %v1497_v46, %v1497_v46  ;;  %v1529_v49 = vsel %vm1273_vm13, %v1128_v38, %v1401_v44  ;;  %v1434_v50 = vsel %vm1178_vm14, %v890_v41, %v1306_v45 }
 0x13b   : > { %v1657_v51 = vpack.c.bf16 %v1529_v49, %v1529_v49  ;;  %v1562_v52 = vpack.c.bf16 %v1434_v50, %v1434_v50  ;;  %v1466_v53 = vsel %vm1210_vm15, %v970_v42, %v1338_v47 }
 0x13c   : > { %1754 = vst.msk [vmem:[%s2400_s25 + $0x150] sm:$0xf] %vm1669_vm3, %v1625_v48  ;;  %v1594_v54 = vpack.c.bf16 %v1466_v53, %v1466_v53  ;;  %v1049_v55 = vpop.f32.mrf.mxu2  ;;  %v892_v59 = vpop.f32.mrf.mxu0 }
 0x13d   : > { %v1129_v56 = vpop.f32.mrf.mxu3  ;;  %1786 = vst.msk [vmem:[%s2400_s25 + $0x1d0] sm:$0xf] %vm1669_vm3, %v1657_v51  ;;  %v1050_v57 = vadd.f32 %v2653_v18, %v1049_v55  ;;  %v972_v60 = vpop.f32.mrf.mxu1  ;;  %v893_v61 = vadd.f32 %v2653_v18, %v892_v59 }
 0x13e   : > { %v1130_v58 = vadd.f32 %v2653_v18, %v1129_v56  ;;  %1691 = vst.msk [vmem:[%s2400_s25 + $0x54] sm:$0xf] %vm1669_vm3, %v1562_v52  ;;  %v973_v62 = vadd.f32 %v2653_v18, %v972_v60 }
 0x13f   : > { %1723 = vst.msk [vmem:[%s2400_s25 + $0xd4] sm:$0xf] %vm1669_vm3, %v1594_v54  ;;  %vm1242_vm1 = vcmp.ge.f32.partialorder %v1050_v57, 0.0  ;;  %v1370_v63 = vmul.f32 0.1, %v1050_v57  ;;  %vm1179_vm0 = vcmp.ge.f32.partialorder %v893_v61, 0.0 }
 0x140   : > { %vm1274_vm2 = vcmp.ge.f32.partialorder %v1130_v58, 0.0  ;;  %v1402_v0 = vmul.f32 0.1, %v1130_v58  ;;  %v1307_v1 = vmul.f32 0.1, %v893_v61  ;;  %vm1211_vm4 = vcmp.ge.f32.partialorder %v973_v62, 0.0 }
 0x141   : > { %v1498_v2 = vsel %vm1242_vm1, %v1050_v57, %v1370_v63  ;;  %v1339_v3 = vmul.f32 0.1, %v973_v62 }
 0x142   : > { %v1626_v4 = vpack.c.bf16 %v1498_v2, %v1498_v2  ;;  %v1530_v5 = vsel %vm1274_vm2, %v1130_v58, %v1402_v0  ;;  %v1435_v6 = vsel %vm1179_vm0, %v893_v61, %v1307_v1 }
 0x143   : > { %v1658_v7 = vpack.c.bf16 %v1530_v5, %v1530_v5  ;;  %v1563_v8 = vpack.c.bf16 %v1435_v6, %v1435_v6  ;;  %v1467_v9 = vsel %vm1211_vm4, %v973_v62, %v1339_v3 }
 0x144   : > { %1755 = vst.msk [vmem:[%s2400_s25 + $0x154] sm:$0xf] %vm1669_vm3, %v1626_v4  ;;  %v1595_v10 = vpack.c.bf16 %v1467_v9, %v1467_v9  ;;  %v1052_v11 = vpop.f32.mrf.mxu2  ;;  %v894_v14 = vpop.f32.mrf.mxu0 }
 0x145   : > { %v1132_v12 = vpop.f32.mrf.mxu3  ;;  %1787 = vst.msk [vmem:[%s2400_s25 + $0x1d4] sm:$0xf] %vm1669_vm3, %v1658_v7  ;;  %v1053_v13 = vadd.f32 %v2653_v18, %v1052_v11  ;;  %v974_v15 = vpop.f32.mrf.mxu1  ;;  %v895_v16 = vadd.f32 %v2653_v18, %v894_v14 }
 0x146   : > { %v1133_v33 = vadd.f32 %v2653_v18, %v1132_v12  ;;  %1692 = vst.msk [vmem:[%s2400_s25 + $0x58] sm:$0xf] %vm1669_vm3, %v1563_v8  ;;  %v975_v17 = vadd.f32 %v2653_v18, %v974_v15 }
 0x147   : > { %1724 = vst.msk [vmem:[%s2400_s25 + $0xd8] sm:$0xf] %vm1669_vm3, %v1595_v10  ;;  %vm1243_vm5 = vcmp.ge.f32.partialorder %v1053_v13, 0.0  ;;  %v1371_v19 = vmul.f32 0.1, %v1053_v13  ;;  %vm1180_vm7 = vcmp.ge.f32.partialorder %v895_v16, 0.0 }
 0x148   : > { %vm1275_vm6 = vcmp.ge.f32.partialorder %v1133_v33, 0.0  ;;  %v1403_v20 = vmul.f32 0.1, %v1133_v33  ;;  %v1308_v21 = vmul.f32 0.1, %v895_v16  ;;  %vm1212_vm8 = vcmp.ge.f32.partialorder %v975_v17, 0.0 }
 0x149   : > { %v1499_v22 = vsel %vm1243_vm5, %v1053_v13, %v1371_v19  ;;  %v1340_v23 = vmul.f32 0.1, %v975_v17 }
 0x14a   : > { %v1627_v24 = vpack.c.bf16 %v1499_v22, %v1499_v22  ;;  %v1531_v25 = vsel %vm1275_vm6, %v1133_v33, %v1403_v20  ;;  %v1436_v26 = vsel %vm1180_vm7, %v895_v16, %v1308_v21 }
 0x14b   : > { %v1659_v27 = vpack.c.bf16 %v1531_v25, %v1531_v25  ;;  %v1564_v28 = vpack.c.bf16 %v1436_v26, %v1436_v26  ;;  %v1468_v29 = vsel %vm1212_vm8, %v975_v17, %v1340_v23 }
 0x14c   : > { %1756 = vst.msk [vmem:[%s2400_s25 + $0x158] sm:$0xf] %vm1669_vm3, %v1627_v24  ;;  %v1596_v30 = vpack.c.bf16 %v1468_v29, %v1468_v29  ;;  %v1054_v31 = vpop.f32.mrf.mxu2  ;;  %v897_v36 = vpop.f32.mrf.mxu0 }
 0x14d   : > { %v1134_v32 = vpop.f32.mrf.mxu3  ;;  %1788 = vst.msk [vmem:[%s2400_s25 + $0x1d8] sm:$0xf] %vm1669_vm3, %v1659_v27  ;;  %v1055_v34 = vadd.f32 %v2653_v18, %v1054_v31  ;;  %v977_v37 = vpop.f32.mrf.mxu1  ;;  %v898_v38 = vadd.f32 %v2653_v18, %v897_v36 }
 0x14e   : > { %v1135_v35 = vadd.f32 %v2653_v18, %v1134_v32  ;;  %1693 = vst.msk [vmem:[%s2400_s25 + $0x5c] sm:$0xf] %vm1669_vm3, %v1564_v28  ;;  %v978_v39 = vadd.f32 %v2653_v18, %v977_v37 }
 0x14f   : > { %1725 = vst.msk [vmem:[%s2400_s25 + $0xdc] sm:$0xf] %vm1669_vm3, %v1596_v30  ;;  %vm1244_vm9 = vcmp.ge.f32.partialorder %v1055_v34, 0.0  ;;  %v1372_v40 = vmul.f32 0.1, %v1055_v34  ;;  %vm1181_vm11 = vcmp.ge.f32.partialorder %v898_v38, 0.0 }
 0x150   : > { %vm1276_vm10 = vcmp.ge.f32.partialorder %v1135_v35, 0.0  ;;  %v1404_v41 = vmul.f32 0.1, %v1135_v35  ;;  %v1309_v42 = vmul.f32 0.1, %v898_v38  ;;  %vm1213_vm12 = vcmp.ge.f32.partialorder %v978_v39, 0.0 }
 0x151   : > { %v1500_v43 = vsel %vm1244_vm9, %v1055_v34, %v1372_v40  ;;  %v1341_v44 = vmul.f32 0.1, %v978_v39 }
 0x152   : > { %v1628_v45 = vpack.c.bf16 %v1500_v43, %v1500_v43  ;;  %v1532_v46 = vsel %vm1276_vm10, %v1135_v35, %v1404_v41  ;;  %v1437_v47 = vsel %vm1181_vm11, %v898_v38, %v1309_v42 }
 0x153   : > { %v1660_v48 = vpack.c.bf16 %v1532_v46, %v1532_v46  ;;  %v1565_v49 = vpack.c.bf16 %v1437_v47, %v1437_v47  ;;  %v1469_v50 = vsel %vm1213_vm12, %v978_v39, %v1341_v44 }
 0x154   : > { %1757 = vst.msk [vmem:[%s2400_s25 + $0x15c] sm:$0xf] %vm1669_vm3, %v1628_v45  ;;  %v1597_v51 = vpack.c.bf16 %v1469_v50, %v1469_v50  ;;  %v1057_v52 = vpop.f32.mrf.mxu2  ;;  %v899_v56 = vpop.f32.mrf.mxu0 }
 0x155   : > { %v1137_v53 = vpop.f32.mrf.mxu3  ;;  %1789 = vst.msk [vmem:[%s2400_s25 + $0x1dc] sm:$0xf] %vm1669_vm3, %v1660_v48  ;;  %v1058_v54 = vadd.f32 %v2653_v18, %v1057_v52  ;;  %v979_v57 = vpop.f32.mrf.mxu1  ;;  %v900_v58 = vadd.f32 %v2653_v18, %v899_v56 }
 0x156   : > { %v1138_v55 = vadd.f32 %v2653_v18, %v1137_v53  ;;  %1694 = vst.msk [vmem:[%s2400_s25 + $0x60] sm:$0xf] %vm1669_vm3, %v1565_v49  ;;  %v980_v59 = vadd.f32 %v2653_v18, %v979_v57 }
 0x157   : > { %1726 = vst.msk [vmem:[%s2400_s25 + $0xe0] sm:$0xf] %vm1669_vm3, %v1597_v51  ;;  %vm1245_vm13 = vcmp.ge.f32.partialorder %v1058_v54, 0.0  ;;  %v1373_v60 = vmul.f32 0.1, %v1058_v54  ;;  %vm1182_vm15 = vcmp.ge.f32.partialorder %v900_v58, 0.0 }
 0x158   : > { %vm1277_vm14 = vcmp.ge.f32.partialorder %v1138_v55, 0.0  ;;  %v1405_v61 = vmul.f32 0.1, %v1138_v55  ;;  %v1310_v62 = vmul.f32 0.1, %v900_v58  ;;  %vm1214_vm1 = vcmp.ge.f32.partialorder %v980_v59, 0.0 }
 0x159   : > { %v1501_v63 = vsel %vm1245_vm13, %v1058_v54, %v1373_v60  ;;  %v1342_v0 = vmul.f32 0.1, %v980_v59 }
 0x15a   : > { %v1629_v1 = vpack.c.bf16 %v1501_v63, %v1501_v63  ;;  %v1533_v2 = vsel %vm1277_vm14, %v1138_v55, %v1405_v61  ;;  %v1438_v3 = vsel %vm1182_vm15, %v900_v58, %v1310_v62 }
 0x15b   : > { %v1661_v4 = vpack.c.bf16 %v1533_v2, %v1533_v2  ;;  %v1566_v5 = vpack.c.bf16 %v1438_v3, %v1438_v3  ;;  %v1470_v6 = vsel %vm1214_vm1, %v980_v59, %v1342_v0 }
 0x15c   : > { %1758 = vst.msk [vmem:[%s2400_s25 + $0x160] sm:$0xf] %vm1669_vm3, %v1629_v1  ;;  %v1598_v7 = vpack.c.bf16 %v1470_v6, %v1470_v6  ;;  %v1059_v8 = vpop.f32.mrf.mxu2  ;;  %v902_v12 = vpop.f32.mrf.mxu0 }
 0x15d   : > { %v1139_v9 = vpop.f32.mrf.mxu3  ;;  %1790 = vst.msk [vmem:[%s2400_s25 + $0x1e0] sm:$0xf] %vm1669_vm3, %v1661_v4  ;;  %v1060_v10 = vadd.f32 %v2653_v18, %v1059_v8  ;;  %v982_v13 = vpop.f32.mrf.mxu1  ;;  %v903_v33 = vadd.f32 %v2653_v18, %v902_v12 }
 0x15e   : > { %v1140_v11 = vadd.f32 %v2653_v18, %v1139_v9  ;;  %1695 = vst.msk [vmem:[%s2400_s25 + $0x64] sm:$0xf] %vm1669_vm3, %v1566_v5  ;;  %v983_v14 = vadd.f32 %v2653_v18, %v982_v13 }
 0x15f   : > { %1727 = vst.msk [vmem:[%s2400_s25 + $0xe4] sm:$0xf] %vm1669_vm3, %v1598_v7  ;;  %vm1246_vm2 = vcmp.ge.f32.partialorder %v1060_v10, 0.0  ;;  %v1374_v15 = vmul.f32 0.1, %v1060_v10  ;;  %vm1183_vm4 = vcmp.ge.f32.partialorder %v903_v33, 0.0 }
 0x160   : > { %vm1278_vm0 = vcmp.ge.f32.partialorder %v1140_v11, 0.0  ;;  %v1406_v16 = vmul.f32 0.1, %v1140_v11  ;;  %v1311_v17 = vmul.f32 0.1, %v903_v33  ;;  %vm1215_vm5 = vcmp.ge.f32.partialorder %v983_v14, 0.0 }
 0x161   : > { %v1502_v19 = vsel %vm1246_vm2, %v1060_v10, %v1374_v15  ;;  %v1343_v20 = vmul.f32 0.1, %v983_v14 }
 0x162   : > { %v1630_v21 = vpack.c.bf16 %v1502_v19, %v1502_v19  ;;  %v1534_v22 = vsel %vm1278_vm0, %v1140_v11, %v1406_v16  ;;  %v1439_v23 = vsel %vm1183_vm4, %v903_v33, %v1311_v17 }
 0x163   : > { %v1662_v24 = vpack.c.bf16 %v1534_v22, %v1534_v22  ;;  %v1567_v25 = vpack.c.bf16 %v1439_v23, %v1439_v23  ;;  %v1471_v26 = vsel %vm1215_vm5, %v983_v14, %v1343_v20 }
 0x164   : > { %1759 = vst.msk [vmem:[%s2400_s25 + $0x164] sm:$0xf] %vm1669_vm3, %v1630_v21  ;;  %v1599_v27 = vpack.c.bf16 %v1471_v26, %v1471_v26  ;;  %v1062_v28 = vpop.f32.mrf.mxu2  ;;  %v904_v32 = vpop.f32.mrf.mxu0 }
 0x165   : > { %v1142_v29 = vpop.f32.mrf.mxu3  ;;  %1791 = vst.msk [vmem:[%s2400_s25 + $0x1e4] sm:$0xf] %vm1669_vm3, %v1662_v24  ;;  %v1063_v30 = vadd.f32 %v2653_v18, %v1062_v28  ;;  %v984_v34 = vpop.f32.mrf.mxu1  ;;  %v905_v35 = vadd.f32 %v2653_v18, %v904_v32 }
 0x166   : > { %v1143_v31 = vadd.f32 %v2653_v18, %v1142_v29  ;;  %1696 = vst.msk [vmem:[%s2400_s25 + $0x68] sm:$0xf] %vm1669_vm3, %v1567_v25  ;;  %v985_v36 = vadd.f32 %v2653_v18, %v984_v34 }
 0x167   : > { %1728 = vst.msk [vmem:[%s2400_s25 + $0xe8] sm:$0xf] %vm1669_vm3, %v1599_v27  ;;  %vm1247_vm6 = vcmp.ge.f32.partialorder %v1063_v30, 0.0  ;;  %v1375_v37 = vmul.f32 0.1, %v1063_v30  ;;  %vm1184_vm8 = vcmp.ge.f32.partialorder %v905_v35, 0.0 }
 0x168   : > { %vm1279_vm7 = vcmp.ge.f32.partialorder %v1143_v31, 0.0  ;;  %v1407_v38 = vmul.f32 0.1, %v1143_v31  ;;  %v1312_v39 = vmul.f32 0.1, %v905_v35  ;;  %vm1216_vm9 = vcmp.ge.f32.partialorder %v985_v36, 0.0 }
 0x169   : > { %v1503_v40 = vsel %vm1247_vm6, %v1063_v30, %v1375_v37  ;;  %v1344_v41 = vmul.f32 0.1, %v985_v36 }
 0x16a   : > { %v1631_v42 = vpack.c.bf16 %v1503_v40, %v1503_v40  ;;  %v1535_v43 = vsel %vm1279_vm7, %v1143_v31, %v1407_v38  ;;  %v1440_v44 = vsel %vm1184_vm8, %v905_v35, %v1312_v39 }
 0x16b   : > { %v1663_v45 = vpack.c.bf16 %v1535_v43, %v1535_v43  ;;  %v1568_v46 = vpack.c.bf16 %v1440_v44, %v1440_v44  ;;  %v1472_v47 = vsel %vm1216_vm9, %v985_v36, %v1344_v41 }
 0x16c   : > { %1760 = vst.msk [vmem:[%s2400_s25 + $0x168] sm:$0xf] %vm1669_vm3, %v1631_v42  ;;  %v1600_v48 = vpack.c.bf16 %v1472_v47, %v1472_v47  ;;  %v1064_v49 = vpop.f32.mrf.mxu2  ;;  %v907_v53 = vpop.f32.mrf.mxu0 }
 0x16d   : > { %v1144_v50 = vpop.f32.mrf.mxu3  ;;  %1792 = vst.msk [vmem:[%s2400_s25 + $0x1e8] sm:$0xf] %vm1669_vm3, %v1663_v45  ;;  %v1065_v51 = vadd.f32 %v2653_v18, %v1064_v49  ;;  %v987_v54 = vpop.f32.mrf.mxu1  ;;  %v908_v55 = vadd.f32 %v2653_v18, %v907_v53 }
 0x16e   : > { %v1145_v52 = vadd.f32 %v2653_v18, %v1144_v50  ;;  %1697 = vst.msk [vmem:[%s2400_s25 + $0x6c] sm:$0xf] %vm1669_vm3, %v1568_v46  ;;  %v988_v56 = vadd.f32 %v2653_v18, %v987_v54 }
 0x16f   : > { %1729 = vst.msk [vmem:[%s2400_s25 + $0xec] sm:$0xf] %vm1669_vm3, %v1600_v48  ;;  %vm1248_vm10 = vcmp.ge.f32.partialorder %v1065_v51, 0.0  ;;  %v1376_v57 = vmul.f32 0.1, %v1065_v51  ;;  %vm1185_vm12 = vcmp.ge.f32.partialorder %v908_v55, 0.0 }
 0x170   : > { %vm1280_vm11 = vcmp.ge.f32.partialorder %v1145_v52, 0.0  ;;  %v1408_v58 = vmul.f32 0.1, %v1145_v52  ;;  %v1313_v59 = vmul.f32 0.1, %v908_v55  ;;  %vm1217_vm13 = vcmp.ge.f32.partialorder %v988_v56, 0.0 }
 0x171   : > { %v1504_v60 = vsel %vm1248_vm10, %v1065_v51, %v1376_v57  ;;  %v1345_v61 = vmul.f32 0.1, %v988_v56 }
 0x172   : > { %v1632_v62 = vpack.c.bf16 %v1504_v60, %v1504_v60  ;;  %v1536_v63 = vsel %vm1280_vm11, %v1145_v52, %v1408_v58  ;;  %v1441_v0 = vsel %vm1185_vm12, %v908_v55, %v1313_v59 }
 0x173   : > { %v1664_v1 = vpack.c.bf16 %v1536_v63, %v1536_v63  ;;  %v1569_v2 = vpack.c.bf16 %v1441_v0, %v1441_v0  ;;  %v1473_v3 = vsel %vm1217_vm13, %v988_v56, %v1345_v61 }
 0x174   : > { %1761 = vst.msk [vmem:[%s2400_s25 + $0x16c] sm:$0xf] %vm1669_vm3, %v1632_v62  ;;  %v1601_v4 = vpack.c.bf16 %v1473_v3, %v1473_v3  ;;  %v1067_v5 = vpop.f32.mrf.mxu2  ;;  %v909_v9 = vpop.f32.mrf.mxu0 }
 0x175   : > { %v1147_v6 = vpop.f32.mrf.mxu3  ;;  %1793 = vst.msk [vmem:[%s2400_s25 + $0x1ec] sm:$0xf] %vm1669_vm3, %v1664_v1  ;;  %v1068_v7 = vadd.f32 %v2653_v18, %v1067_v5  ;;  %v989_v10 = vpop.f32.mrf.mxu1  ;;  %v910_v11 = vadd.f32 %v2653_v18, %v909_v9 }
 0x176   : > { %v1148_v8 = vadd.f32 %v2653_v18, %v1147_v6  ;;  %1698 = vst.msk [vmem:[%s2400_s25 + $0x70] sm:$0xf] %vm1669_vm3, %v1569_v2  ;;  %v990_v12 = vadd.f32 %v2653_v18, %v989_v10 }
 0x177   : > { %1730 = vst.msk [vmem:[%s2400_s25 + $0xf0] sm:$0xf] %vm1669_vm3, %v1601_v4  ;;  %vm1249_vm14 = vcmp.ge.f32.partialorder %v1068_v7, 0.0  ;;  %v1377_v13 = vmul.f32 0.1, %v1068_v7  ;;  %vm1186_vm1 = vcmp.ge.f32.partialorder %v910_v11, 0.0 }
 0x178   : > { %vm1281_vm15 = vcmp.ge.f32.partialorder %v1148_v8, 0.0  ;;  %v1409_v33 = vmul.f32 0.1, %v1148_v8  ;;  %v1314_v14 = vmul.f32 0.1, %v910_v11  ;;  %vm1218_vm2 = vcmp.ge.f32.partialorder %v990_v12, 0.0 }
 0x179   : > { %v1505_v15 = vsel %vm1249_vm14, %v1068_v7, %v1377_v13  ;;  %v1346_v16 = vmul.f32 0.1, %v990_v12 }
 0x17a   : > { %v1633_v17 = vpack.c.bf16 %v1505_v15, %v1505_v15  ;;  %v1537_v19 = vsel %vm1281_vm15, %v1148_v8, %v1409_v33  ;;  %v1442_v20 = vsel %vm1186_vm1, %v910_v11, %v1314_v14 }
 0x17b   : > { %v1665_v21 = vpack.c.bf16 %v1537_v19, %v1537_v19  ;;  %v1570_v22 = vpack.c.bf16 %v1442_v20, %v1442_v20  ;;  %v1474_v23 = vsel %vm1218_vm2, %v990_v12, %v1346_v16 }
 0x17c   : > { %1762 = vst.msk [vmem:[%s2400_s25 + $0x170] sm:$0xf] %vm1669_vm3, %v1633_v17  ;;  %v1602_v24 = vpack.c.bf16 %v1474_v23, %v1474_v23  ;;  %v1069_v25 = vpop.f32.mrf.mxu2  ;;  %v912_v29 = vpop.f32.mrf.mxu0 }
 0x17d   : > { %v1149_v26 = vpop.f32.mrf.mxu3  ;;  %1794 = vst.msk [vmem:[%s2400_s25 + $0x1f0] sm:$0xf] %vm1669_vm3, %v1665_v21  ;;  %v1070_v27 = vadd.f32 %v2653_v18, %v1069_v25  ;;  %v992_v30 = vpop.f32.mrf.mxu1  ;;  %v913_v31 = vadd.f32 %v2653_v18, %v912_v29 }
 0x17e   : > { %v1150_v28 = vadd.f32 %v2653_v18, %v1149_v26  ;;  %1699 = vst.msk [vmem:[%s2400_s25 + $0x74] sm:$0xf] %vm1669_vm3, %v1570_v22  ;;  %v993_v32 = vadd.f32 %v2653_v18, %v992_v30 }
 0x17f   : > { %1731 = vst.msk [vmem:[%s2400_s25 + $0xf4] sm:$0xf] %vm1669_vm3, %v1602_v24  ;;  %vm1250_vm0 = vcmp.ge.f32.partialorder %v1070_v27, 0.0  ;;  %v1378_v34 = vmul.f32 0.1, %v1070_v27  ;;  %vm1187_vm5 = vcmp.ge.f32.partialorder %v913_v31, 0.0 }
 0x180   : > { %vm1282_vm4 = vcmp.ge.f32.partialorder %v1150_v28, 0.0  ;;  %v1410_v35 = vmul.f32 0.1, %v1150_v28  ;;  %v1315_v36 = vmul.f32 0.1, %v913_v31  ;;  %vm1219_vm6 = vcmp.ge.f32.partialorder %v993_v32, 0.0 }
 0x181   : > { %v1506_v37 = vsel %vm1250_vm0, %v1070_v27, %v1378_v34  ;;  %v1347_v38 = vmul.f32 0.1, %v993_v32 }
 0x182   : > { %v1634_v39 = vpack.c.bf16 %v1506_v37, %v1506_v37  ;;  %v1538_v40 = vsel %vm1282_vm4, %v1150_v28, %v1410_v35  ;;  %v1443_v41 = vsel %vm1187_vm5, %v913_v31, %v1315_v36 }
 0x183   : > { %v1666_v42 = vpack.c.bf16 %v1538_v40, %v1538_v40  ;;  %v1571_v43 = vpack.c.bf16 %v1443_v41, %v1443_v41  ;;  %v1475_v44 = vsel %vm1219_vm6, %v993_v32, %v1347_v38 }
 0x184   : > { %1763 = vst.msk [vmem:[%s2400_s25 + $0x174] sm:$0xf] %vm1669_vm3, %v1634_v39  ;;  %v1603_v45 = vpack.c.bf16 %v1475_v44, %v1475_v44  ;;  %v1072_v46 = vpop.f32.mrf.mxu2  ;;  %v914_v50 = vpop.f32.mrf.mxu0 }
 0x185   : > { %v1152_v47 = vpop.f32.mrf.mxu3  ;;  %1795 = vst.msk [vmem:[%s2400_s25 + $0x1f4] sm:$0xf] %vm1669_vm3, %v1666_v42  ;;  %v1073_v48 = vadd.f32 %v2653_v18, %v1072_v46  ;;  %v994_v51 = vpop.f32.mrf.mxu1  ;;  %v915_v52 = vadd.f32 %v2653_v18, %v914_v50 }
 0x186   : > { %v1153_v49 = vadd.f32 %v2653_v18, %v1152_v47  ;;  %1700 = vst.msk [vmem:[%s2400_s25 + $0x78] sm:$0xf] %vm1669_vm3, %v1571_v43  ;;  %v995_v53 = vadd.f32 %v2653_v18, %v994_v51 }
 0x187   : > { %1732 = vst.msk [vmem:[%s2400_s25 + $0xf8] sm:$0xf] %vm1669_vm3, %v1603_v45  ;;  %vm1251_vm7 = vcmp.ge.f32.partialorder %v1073_v48, 0.0  ;;  %v1379_v54 = vmul.f32 0.1, %v1073_v48  ;;  %vm1188_vm9 = vcmp.ge.f32.partialorder %v915_v52, 0.0 }
 0x188   : > { %vm1283_vm8 = vcmp.ge.f32.partialorder %v1153_v49, 0.0  ;;  %v1411_v55 = vmul.f32 0.1, %v1153_v49  ;;  %v1316_v56 = vmul.f32 0.1, %v915_v52  ;;  %vm1220_vm10 = vcmp.ge.f32.partialorder %v995_v53, 0.0 }
 0x189   : > { %v1507_v57 = vsel %vm1251_vm7, %v1073_v48, %v1379_v54  ;;  %v1348_v58 = vmul.f32 0.1, %v995_v53 }
 0x18a   : > { %v1635_v59 = vpack.c.bf16 %v1507_v57, %v1507_v57  ;;  %v1539_v60 = vsel %vm1283_vm8, %v1153_v49, %v1411_v55  ;;  %v1444_v61 = vsel %vm1188_vm9, %v915_v52, %v1316_v56 }
 0x18b   : > { %v1667_v62 = vpack.c.bf16 %v1539_v60, %v1539_v60  ;;  %v1572_v63 = vpack.c.bf16 %v1444_v61, %v1444_v61  ;;  %v1476_v0 = vsel %vm1220_vm10, %v995_v53, %v1348_v58 }
 0x18c   : > { %1764 = vst.msk [vmem:[%s2400_s25 + $0x178] sm:$0xf] %vm1669_vm3, %v1635_v59  ;;  %v1604_v1 = vpack.c.bf16 %v1476_v0, %v1476_v0  ;;  %v1074_v2 = vpop.f32.mrf.mxu2 }
 0x18d   : > { %v1154_v3 = vpop.f32.mrf.mxu3  ;;  %1796 = vst.msk [vmem:[%s2400_s25 + $0x1f8] sm:$0xf] %vm1669_vm3, %v1667_v62  ;;  %v1075_v4 = vadd.f32 %v2653_v18, %v1074_v2 }
 0x18e   : > { %v1155_v5 = vadd.f32 %v2653_v18, %v1154_v3  ;;  %1701 = vst.msk [vmem:[%s2400_s25 + $0x7c] sm:$0xf] %vm1669_vm3, %v1572_v63 }
 0x18f   : > { %1733 = vst.msk [vmem:[%s2400_s25 + $0xfc] sm:$0xf] %vm1669_vm3, %v1604_v1  ;;  %vm1252_vm11 = vcmp.ge.f32.partialorder %v1075_v4, 0.0  ;;  %v1380_v6 = vmul.f32 0.1, %v1075_v4 }
 0x190   : > { %vm1284_vm12 = vcmp.ge.f32.partialorder %v1155_v5, 0.0  ;;  %v1412_v7 = vmul.f32 0.1, %v1155_v5 }
 0x191   : > { %v1508_v8 = vsel %vm1252_vm11, %v1075_v4, %v1380_v6 }
 0x192   : > { %v1636_v9 = vpack.c.bf16 %v1508_v8, %v1508_v8  ;;  %v1540_v10 = vsel %vm1284_vm12, %v1155_v5, %v1412_v7 }
 0x193   : > { %v1668_v11 = vpack.c.bf16 %v1540_v10, %v1540_v10 }
 0x194   : > { %1765 = vst.msk [vmem:[%s2400_s25 + $0x17c] sm:$0xf] %vm1669_vm3, %v1636_v9 }
 0x195   : > { %1797 = vst.msk [vmem:[%s2400_s25 + $0x1fc] sm:$0xf] %vm1669_vm3, %v1668_v11 }
 0x196 PF: > { %s13_s12 = sadd.s32 1, %s2273_s12  }
 0x197   : > { %p10_p4 = scmp.ge.s32.totalorder %s13_s12, 4  }
 0x199   :  { %12 = sbr.rel (!%p10_p4) target bundleno = 1 (0x1), region = 62 }

// kernel: discriminator_forward.3
= control target key start
LH: loop header
LB: loop body
LE: loop exit
PB: predicated region body
PF: predicated region fallthrough
CT: control target
= control target key end

     0   :  { %s868_s12 = smov 0   ;;  %s1037_s0 = inlined_call_operand.vmem [shape: bf16[512,128], index: 0, kind: input, shape index: {}]   ;;  %s1038_s1 = inlined_call_operand.vmem [shape: bf16[128,16], index: 1, kind: input, shape index: {}]   ;;  %s1039_s2 = inlined_call_operand.vmem [shape: f32[1,16], index: 2, kind: input, shape index: {}]   ;;  %s1040_s3 = inlined_call_operand.vmem [shape: bf16[512,16], index: 3, kind: output, shape index: {}]  }
   0x1 LB: > { %s676_s13 = sadd.s32 4294967295, %s846_s12   ;;  %p680_p0 = scmp.ge.s32.totalorder %s846_s12, 1  ;;  %s846_s12 = sphi %s868_s12, %s13_s12  }
   0x2   : > { %p138_p1 = scmp.lt.s32.totalorder %s846_s12, 3 }
   0x4   : > { %p139_p2 = pnand %p680_p0, %p138_p1 }
   0x5   : > { %s681_s22 = sshll.u32 (!%p139_p2), %s676_s13, 5 }
   0x6   : > { %142 = sbr.rel (%p139_p2) target bundleno = 241 (0xf1), region = 32  ;;  %p163_p3 = scmp.lt.s32.totalorder (!%p139_p2), %s681_s22, 63 }
   0xb   : > { %v806_v0 = vld [vmem:[%s1038_s1 + $0x38] sm:$0xff]  ;;  %v805_v1 = vld [vmem:[%s1038_s1 + $0x30] sm:$0xff]  ;;  %v804_v2 = vld [vmem:[%s1038_s1 + $0x28] sm:$0xff]  ;;  %s1042_s22 = smov (!%p163_p3, %s681_s22), 63  ;;  %vm587_vm2 = vcmask 125952  }
   0xc   : > { %370 = vmatpush.bf16.msra.mxu0 %v806_v0  ;;  %807 = vmatpush.bf16.msra.mxu1 %v806_v0  ;;  %v803_v3 = vld [vmem:[%s1038_s1 + $0x20] sm:$0xff]  ;;  %v802_v4 = vld [vmem:[%s1038_s1 + $0x18] sm:$0xff]  ;;  %v801_v5 = vld [vmem:[%s1038_s1 + $0x10] sm:$0xff]  ;;  %s682_s29 = sshll.u32 %s1042_s22, 2 }
   0xd   : > { %808 = vmatpush.bf16.msra.mxu2 %v806_v0  ;;  %809 = vmatpush.bf16.msra.mxu3 %v806_v0  ;;  %v800_v6 = vld [vmem:[%s1038_s1 + $0x8] sm:$0xff]  ;;  %v799_v7 = vld [vmem:[%s1038_s1] sm:$0xff]  ;;  %s908_s7 = scalar_lea.vmem %s1037_s0, %s682_s29  ;;  %s938_s13 = scalar_lea.vmem %s1040_s3, %s682_s29 }
   0xe   : > { %v783_v8 = vld [vmem:[%s908_s7] sm:$0xff]  ;;  %v784_v12 = vld [vmem:[%s908_s7 + $0x8] sm:$0xff]  ;;  %v785_v16 = vld [vmem:[%s908_s7 + $0x10] sm:$0xff] }
   0xf   : > { %v787_v9 = vld [vmem:[%s908_s7 + $0x20] sm:$0xff]  ;;  %v788_v13 = vld [vmem:[%s908_s7 + $0x28] sm:$0xff]  ;;  %v789_v17 = vld [vmem:[%s908_s7 + $0x30] sm:$0xff] }
  0x10   : > { %371 = vmatpush.bf16.msra.mxu0 %v805_v1  ;;  %810 = vmatpush.bf16.msra.mxu1 %v805_v1  ;;  %v791_v10 = vld [vmem:[%s908_s7 + $0x40] sm:$0xff]  ;;  %v792_v14 = vld [vmem:[%s908_s7 + $0x48] sm:$0xff]  ;;  %v793_v18 = vld [vmem:[%s908_s7 + $0x50] sm:$0xff] }
  0x11   : > { %811 = vmatpush.bf16.msra.mxu2 %v805_v1  ;;  %812 = vmatpush.bf16.msra.mxu3 %v805_v1  ;;  %v795_v11 = vld [vmem:[%s908_s7 + $0x60] sm:$0xff]  ;;  %v796_v15 = vld [vmem:[%s908_s7 + $0x68] sm:$0xff]  ;;  %v797_v19 = vld [vmem:[%s908_s7 + $0x70] sm:$0xff] }
  0x12   : > { %v786_v20 = vld [vmem:[%s908_s7 + $0x18] sm:$0xff]  ;;  %v929_v24 = vld [vmem:[%s1039_s2] ss:$0 sm:$0xff] }
  0x13   : > { %v790_v21 = vld [vmem:[%s908_s7 + $0x38] sm:$0xff] }
  0x14   : > { %372 = vmatpush.bf16.msra.mxu0 %v804_v2  ;;  %813 = vmatpush.bf16.msra.mxu1 %v804_v2  ;;  %v794_v22 = vld [vmem:[%s908_s7 + $0x58] sm:$0xff] }
  0x15   : > { %814 = vmatpush.bf16.msra.mxu2 %v804_v2  ;;  %815 = vmatpush.bf16.msra.mxu3 %v804_v2  ;;  %v798_v23 = vld [vmem:[%s908_s7 + $0x78] sm:$0xff] }
  0x18   : > { %373 = vmatpush.bf16.msra.mxu0 %v803_v3  ;;  %816 = vmatpush.bf16.msra.mxu1 %v803_v3 }
  0x19   : > { %817 = vmatpush.bf16.msra.mxu2 %v803_v3  ;;  %818 = vmatpush.bf16.msra.mxu3 %v803_v3 }
  0x1c   : > { %374 = vmatpush.bf16.msra.mxu0 %v802_v4  ;;  %819 = vmatpush.bf16.msra.mxu1 %v802_v4 }
  0x1d   : > { %820 = vmatpush.bf16.msra.mxu2 %v802_v4  ;;  %821 = vmatpush.bf16.msra.mxu3 %v802_v4 }
  0x20   : > { %375 = vmatpush.bf16.msra.mxu0 %v801_v5  ;;  %822 = vmatpush.bf16.msra.mxu1 %v801_v5 }
  0x21   : > { %823 = vmatpush.bf16.msra.mxu2 %v801_v5  ;;  %824 = vmatpush.bf16.msra.mxu3 %v801_v5 }
  0x24   : > { %376 = vmatpush.bf16.msra.mxu0 %v800_v6  ;;  %825 = vmatpush.bf16.msra.mxu1 %v800_v6 }
  0x25   : > { %826 = vmatpush.bf16.msra.mxu2 %v800_v6  ;;  %827 = vmatpush.bf16.msra.mxu3 %v800_v6 }
  0x28   : > { %377 = vmatpush.bf16.msra.mxu0 %v799_v7  ;;  %828 = vmatpush.bf16.msra.mxu1 %v799_v7 }
  0x29   : > { %829 = vmatpush.bf16.msra.mxu2 %v799_v7  ;;  %830 = vmatpush.bf16.msra.mxu3 %v799_v7 }
  0x2b   : > { %378 = vmatmul.bf16.vlgmr.msra.gmra.mxu0 %v783_v8  ;;  %398 = vmatmul.bf16.vlgmr.msra.gmra.mxu1 %v787_v9 }
  0x2c   : > { %418 = vmatmul.bf16.vlgmr.msra.gmra.mxu2 %v791_v10  ;;  %438 = vmatmul.bf16.vlgmr.msra.gmra.mxu3 %v795_v11 }
  0x3b   : > { %383 = vmatmul.bf16.gmra.mxu0 %v784_v12  ;;  %403 = vmatmul.bf16.gmra.mxu1 %v788_v13 }
  0x3c   : > { %423 = vmatmul.bf16.gmra.mxu2 %v792_v14  ;;  %443 = vmatmul.bf16.gmra.mxu3 %v796_v15 }
  0x4b   : > { %388 = vmatmul.bf16.gmra.mxu0 %v785_v16  ;;  %408 = vmatmul.bf16.gmra.mxu1 %v789_v17 }
  0x4c   : > { %428 = vmatmul.bf16.gmra.mxu2 %v793_v18  ;;  %448 = vmatmul.bf16.gmra.mxu3 %v797_v19 }
  0x5b   : > { %393 = vmatmul.bf16.gmra.mxu0 %v786_v20  ;;  %413 = vmatmul.bf16.gmra.mxu1 %v790_v21 }
  0x5c   : > { %433 = vmatmul.bf16.gmra.mxu2 %v794_v22  ;;  %453 = vmatmul.bf16.gmra.mxu3 %v798_v23 }
  0xa8   : > { %v379_v25 = vpop.f32.mrf.mxu0  ;;  %v399_v26 = vpop.f32.mrf.mxu1 }
  0xa9   : > { %v380_v27 = vadd.f32 %v929_v24, %v379_v25  ;;  %v400_v28 = vadd.f32 %v929_v24, %v399_v26 }
  0xab   : > { %vm459_vm0 = vcmp.ge.f32.partialorder %v380_v27, 0.0  ;;  %v491_v29 = vmul.f32 0.1, %v380_v27  ;;  %vm467_vm1 = vcmp.ge.f32.partialorder %v400_v28, 0.0  ;;  %v499_v30 = vmul.f32 0.1, %v400_v28 }
  0xad   : > { %v523_v31 = vsel %vm459_vm0, %v380_v27, %v491_v29  ;;  %v531_v32 = vsel %vm467_vm1, %v400_v28, %v499_v30 }
  0xae   : > { %v555_v33 = vpack.c.bf16 %v523_v31, %v523_v31  ;;  %v563_v34 = vpack.c.bf16 %v531_v32, %v531_v32 }
  0xaf   : > { %v419_v35 = vpop.f32.mrf.mxu2  ;;  %v439_v36 = vpop.f32.mrf.mxu3 }
  0xb0   : > { %588 = vst.msk [vmem:[%s938_s13] sm:$0xf] %vm587_vm2, %v555_v33  ;;  %v420_v37 = vadd.f32 %v929_v24, %v419_v35  ;;  %v440_v38 = vadd.f32 %v929_v24, %v439_v36  ;;  %v381_v39 = vpop.f32.mrf.mxu0  ;;  %v401_v40 = vpop.f32.mrf.mxu1 }
  0xb1   : > { %596 = vst.msk [vmem:[%s938_s13 + $0x20] sm:$0xf] %vm587_vm2, %v563_v34  ;;  %v382_v41 = vadd.f32 %v929_v24, %v381_v39  ;;  %v402_v42 = vadd.f32 %v929_v24, %v401_v40 }
  0xb2   : > { %vm475_vm3 = vcmp.ge.f32.partialorder %v420_v37, 0.0  ;;  %v507_v43 = vmul.f32 0.1, %v420_v37  ;;  %vm483_vm4 = vcmp.ge.f32.partialorder %v440_v38, 0.0  ;;  %v515_v44 = vmul.f32 0.1, %v440_v38 }
  0xb3   : > { %vm460_vm5 = vcmp.ge.f32.partialorder %v382_v41, 0.0  ;;  %v492_v45 = vmul.f32 0.1, %v382_v41  ;;  %vm468_vm6 = vcmp.ge.f32.partialorder %v402_v42, 0.0  ;;  %v500_v46 = vmul.f32 0.1, %v402_v42 }
  0xb4   : > { %v539_v47 = vsel %vm475_vm3, %v420_v37, %v507_v43  ;;  %v547_v48 = vsel %vm483_vm4, %v440_v38, %v515_v44 }
  0xb5   : > { %v571_v49 = vpack.c.bf16 %v539_v47, %v539_v47  ;;  %v579_v50 = vpack.c.bf16 %v547_v48, %v547_v48  ;;  %v524_v51 = vsel %vm460_vm5, %v382_v41, %v492_v45  ;;  %v532_v52 = vsel %vm468_vm6, %v402_v42, %v500_v46 }
  0xb6   : > { %v556_v53 = vpack.c.bf16 %v524_v51, %v524_v51  ;;  %v564_v54 = vpack.c.bf16 %v532_v52, %v532_v52 }
  0xb7   : > { %604 = vst.msk [vmem:[%s938_s13 + $0x40] sm:$0xf] %vm587_vm2, %v571_v49  ;;  %v421_v55 = vpop.f32.mrf.mxu2  ;;  %v441_v56 = vpop.f32.mrf.mxu3 }
  0xb8   : > { %612 = vst.msk [vmem:[%s938_s13 + $0x60] sm:$0xf] %vm587_vm2, %v579_v50  ;;  %v422_v57 = vadd.f32 %v929_v24, %v421_v55  ;;  %v442_v58 = vadd.f32 %v929_v24, %v441_v56  ;;  %v384_v59 = vpop.f32.mrf.mxu0  ;;  %v404_v60 = vpop.f32.mrf.mxu1 }
  0xb9   : > { %589 = vst.msk [vmem:[%s938_s13 + $0x4] sm:$0xf] %vm587_vm2, %v556_v53  ;;  %v385_v61 = vadd.f32 %v929_v24, %v384_v59  ;;  %v405_v62 = vadd.f32 %v929_v24, %v404_v60 }
  0xba   : > { %597 = vst.msk [vmem:[%s938_s13 + $0x24] sm:$0xf] %vm587_vm2, %v564_v54  ;;  %vm476_vm7 = vcmp.ge.f32.partialorder %v422_v57, 0.0  ;;  %v508_v63 = vmul.f32 0.1, %v422_v57  ;;  %vm484_vm8 = vcmp.ge.f32.partialorder %v442_v58, 0.0 }
  0xbb   : > { %v516_v0 = vmul.f32 0.1, %v442_v58  ;;  %vm461_vm9 = vcmp.ge.f32.partialorder %v385_v61, 0.0  ;;  %v493_v1 = vmul.f32 0.1, %v385_v61  ;;  %vm469_vm10 = vcmp.ge.f32.partialorder %v405_v62, 0.0 }
  0xbc   : > { %v540_v2 = vsel %vm476_vm7, %v422_v57, %v508_v63  ;;  %v501_v3 = vmul.f32 0.1, %v405_v62 }
  0xbd   : > { %v572_v4 = vpack.c.bf16 %v540_v2, %v540_v2  ;;  %v548_v5 = vsel %vm484_vm8, %v442_v58, %v516_v0  ;;  %v525_v6 = vsel %vm461_vm9, %v385_v61, %v493_v1 }
  0xbe   : > { %v580_v7 = vpack.c.bf16 %v548_v5, %v548_v5  ;;  %v557_v8 = vpack.c.bf16 %v525_v6, %v525_v6  ;;  %v533_v9 = vsel %vm469_vm10, %v405_v62, %v501_v3 }
  0xbf   : > { %605 = vst.msk [vmem:[%s938_s13 + $0x44] sm:$0xf] %vm587_vm2, %v572_v4  ;;  %v565_v10 = vpack.c.bf16 %v533_v9, %v533_v9  ;;  %v424_v11 = vpop.f32.mrf.mxu2  ;;  %v444_v12 = vpop.f32.mrf.mxu3 }
  0xc0   : > { %613 = vst.msk [vmem:[%s938_s13 + $0x64] sm:$0xf] %vm587_vm2, %v580_v7  ;;  %v425_v13 = vadd.f32 %v929_v24, %v424_v11  ;;  %v445_v14 = vadd.f32 %v929_v24, %v444_v12  ;;  %v386_v15 = vpop.f32.mrf.mxu0  ;;  %v406_v16 = vpop.f32.mrf.mxu1 }
  0xc1   : > { %590 = vst.msk [vmem:[%s938_s13 + $0x8] sm:$0xf] %vm587_vm2, %v557_v8  ;;  %v387_v17 = vadd.f32 %v929_v24, %v386_v15  ;;  %v407_v18 = vadd.f32 %v929_v24, %v406_v16 }
  0xc2   : > { %598 = vst.msk [vmem:[%s938_s13 + $0x28] sm:$0xf] %vm587_vm2, %v565_v10  ;;  %vm477_vm11 = vcmp.ge.f32.partialorder %v425_v13, 0.0  ;;  %v509_v19 = vmul.f32 0.1, %v425_v13  ;;  %vm485_vm12 = vcmp.ge.f32.partialorder %v445_v14, 0.0 }
  0xc3   : > { %v517_v20 = vmul.f32 0.1, %v445_v14  ;;  %vm462_vm13 = vcmp.ge.f32.partialorder %v387_v17, 0.0  ;;  %v494_v21 = vmul.f32 0.1, %v387_v17  ;;  %vm470_vm14 = vcmp.ge.f32.partialorder %v407_v18, 0.0 }
  0xc4   : > { %v541_v22 = vsel %vm477_vm11, %v425_v13, %v509_v19  ;;  %v502_v23 = vmul.f32 0.1, %v407_v18 }
  0xc5   : > { %v573_v25 = vpack.c.bf16 %v541_v22, %v541_v22  ;;  %v549_v26 = vsel %vm485_vm12, %v445_v14, %v517_v20  ;;  %v526_v27 = vsel %vm462_vm13, %v387_v17, %v494_v21 }
  0xc6   : > { %v581_v28 = vpack.c.bf16 %v549_v26, %v549_v26  ;;  %v558_v29 = vpack.c.bf16 %v526_v27, %v526_v27  ;;  %v534_v30 = vsel %vm470_vm14, %v407_v18, %v502_v23 }
  0xc7   : > { %606 = vst.msk [vmem:[%s938_s13 + $0x48] sm:$0xf] %vm587_vm2, %v573_v25  ;;  %v566_v31 = vpack.c.bf16 %v534_v30, %v534_v30  ;;  %v426_v32 = vpop.f32.mrf.mxu2  ;;  %v446_v33 = vpop.f32.mrf.mxu3 }
  0xc8   : > { %614 = vst.msk [vmem:[%s938_s13 + $0x68] sm:$0xf] %vm587_vm2, %v581_v28  ;;  %v427_v34 = vadd.f32 %v929_v24, %v426_v32  ;;  %v447_v35 = vadd.f32 %v929_v24, %v446_v33  ;;  %v389_v36 = vpop.f32.mrf.mxu0  ;;  %v409_v37 = vpop.f32.mrf.mxu1 }
  0xc9   : > { %591 = vst.msk [vmem:[%s938_s13 + $0xc] sm:$0xf] %vm587_vm2, %v558_v29  ;;  %v390_v38 = vadd.f32 %v929_v24, %v389_v36  ;;  %v410_v39 = vadd.f32 %v929_v24, %v409_v37 }
  0xca   : > { %599 = vst.msk [vmem:[%s938_s13 + $0x2c] sm:$0xf] %vm587_vm2, %v566_v31  ;;  %vm478_vm15 = vcmp.ge.f32.partialorder %v427_v34, 0.0  ;;  %v510_v40 = vmul.f32 0.1, %v427_v34  ;;  %vm486_vm0 = vcmp.ge.f32.partialorder %v447_v35, 0.0 }
  0xcb   : > { %v518_v41 = vmul.f32 0.1, %v447_v35  ;;  %vm463_vm1 = vcmp.ge.f32.partialorder %v390_v38, 0.0  ;;  %v495_v42 = vmul.f32 0.1, %v390_v38  ;;  %vm471_vm3 = vcmp.ge.f32.partialorder %v410_v39, 0.0 }
  0xcc   : > { %v542_v43 = vsel %vm478_vm15, %v427_v34, %v510_v40  ;;  %v503_v44 = vmul.f32 0.1, %v410_v39 }
  0xcd   : > { %v574_v45 = vpack.c.bf16 %v542_v43, %v542_v43  ;;  %v550_v46 = vsel %vm486_vm0, %v447_v35, %v518_v41  ;;  %v527_v47 = vsel %vm463_vm1, %v390_v38, %v495_v42 }
  0xce   : > { %v582_v48 = vpack.c.bf16 %v550_v46, %v550_v46  ;;  %v559_v49 = vpack.c.bf16 %v527_v47, %v527_v47  ;;  %v535_v50 = vsel %vm471_vm3, %v410_v39, %v503_v44 }
  0xcf   : > { %607 = vst.msk [vmem:[%s938_s13 + $0x4c] sm:$0xf] %vm587_vm2, %v574_v45  ;;  %v567_v51 = vpack.c.bf16 %v535_v50, %v535_v50  ;;  %v429_v52 = vpop.f32.mrf.mxu2  ;;  %v449_v53 = vpop.f32.mrf.mxu3 }
  0xd0   : > { %615 = vst.msk [vmem:[%s938_s13 + $0x6c] sm:$0xf] %vm587_vm2, %v582_v48  ;;  %v430_v54 = vadd.f32 %v929_v24, %v429_v52  ;;  %v450_v55 = vadd.f32 %v929_v24, %v449_v53  ;;  %v391_v56 = vpop.f32.mrf.mxu0  ;;  %v411_v57 = vpop.f32.mrf.mxu1 }
  0xd1   : > { %592 = vst.msk [vmem:[%s938_s13 + $0x10] sm:$0xf] %vm587_vm2, %v559_v49  ;;  %v392_v58 = vadd.f32 %v929_v24, %v391_v56  ;;  %v412_v59 = vadd.f32 %v929_v24, %v411_v57 }
  0xd2   : > { %600 = vst.msk [vmem:[%s938_s13 + $0x30] sm:$0xf] %vm587_vm2, %v567_v51  ;;  %vm479_vm4 = vcmp.ge.f32.partialorder %v430_v54, 0.0  ;;  %v511_v60 = vmul.f32 0.1, %v430_v54  ;;  %vm487_vm5 = vcmp.ge.f32.partialorder %v450_v55, 0.0 }
  0xd3   : > { %v519_v61 = vmul.f32 0.1, %v450_v55  ;;  %vm464_vm6 = vcmp.ge.f32.partialorder %v392_v58, 0.0  ;;  %v496_v62 = vmul.f32 0.1, %v392_v58  ;;  %vm472_vm7 = vcmp.ge.f32.partialorder %v412_v59, 0.0 }
  0xd4   : > { %v543_v63 = vsel %vm479_vm4, %v430_v54, %v511_v60  ;;  %v504_v0 = vmul.f32 0.1, %v412_v59 }
  0xd5   : > { %v575_v1 = vpack.c.bf16 %v543_v63, %v543_v63  ;;  %v551_v2 = vsel %vm487_vm5, %v450_v55, %v519_v61  ;;  %v528_v3 = vsel %vm464_vm6, %v392_v58, %v496_v62 }
  0xd6   : > { %v583_v4 = vpack.c.bf16 %v551_v2, %v551_v2  ;;  %v560_v5 = vpack.c.bf16 %v528_v3, %v528_v3  ;;  %v536_v6 = vsel %vm472_vm7, %v412_v59, %v504_v0 }
  0xd7   : > { %608 = vst.msk [vmem:[%s938_s13 + $0x50] sm:$0xf] %vm587_vm2, %v575_v1  ;;  %v568_v7 = vpack.c.bf16 %v536_v6, %v536_v6  ;;  %v431_v8 = vpop.f32.mrf.mxu2  ;;  %v451_v9 = vpop.f32.mrf.mxu3 }
  0xd8   : > { %616 = vst.msk [vmem:[%s938_s13 + $0x70] sm:$0xf] %vm587_vm2, %v583_v4  ;;  %v432_v10 = vadd.f32 %v929_v24, %v431_v8  ;;  %v452_v11 = vadd.f32 %v929_v24, %v451_v9  ;;  %v394_v12 = vpop.f32.mrf.mxu0  ;;  %v414_v13 = vpop.f32.mrf.mxu1 }
  0xd9   : > { %593 = vst.msk [vmem:[%s938_s13 + $0x14] sm:$0xf] %vm587_vm2, %v560_v5  ;;  %v395_v14 = vadd.f32 %v929_v24, %v394_v12  ;;  %v415_v15 = vadd.f32 %v929_v24, %v414_v13 }
  0xda   : > { %601 = vst.msk [vmem:[%s938_s13 + $0x34] sm:$0xf] %vm587_vm2, %v568_v7  ;;  %vm480_vm8 = vcmp.ge.f32.partialorder %v432_v10, 0.0  ;;  %v512_v16 = vmul.f32 0.1, %v432_v10  ;;  %vm488_vm9 = vcmp.ge.f32.partialorder %v452_v11, 0.0 }
  0xdb   : > { %v520_v17 = vmul.f32 0.1, %v452_v11  ;;  %vm465_vm10 = vcmp.ge.f32.partialorder %v395_v14, 0.0  ;;  %v497_v18 = vmul.f32 0.1, %v395_v14  ;;  %vm473_vm11 = vcmp.ge.f32.partialorder %v415_v15, 0.0 }
  0xdc   : > { %v544_v19 = vsel %vm480_vm8, %v432_v10, %v512_v16  ;;  %v505_v20 = vmul.f32 0.1, %v415_v15 }
  0xdd   : > { %v576_v21 = vpack.c.bf16 %v544_v19, %v544_v19  ;;  %v552_v22 = vsel %vm488_vm9, %v452_v11, %v520_v17  ;;  %v529_v23 = vsel %vm465_vm10, %v395_v14, %v497_v18 }
  0xde   : > { %v584_v25 = vpack.c.bf16 %v552_v22, %v552_v22  ;;  %v561_v26 = vpack.c.bf16 %v529_v23, %v529_v23  ;;  %v537_v27 = vsel %vm473_vm11, %v415_v15, %v505_v20 }
  0xdf   : > { %609 = vst.msk [vmem:[%s938_s13 + $0x54] sm:$0xf] %vm587_vm2, %v576_v21  ;;  %v569_v28 = vpack.c.bf16 %v537_v27, %v537_v27  ;;  %v434_v29 = vpop.f32.mrf.mxu2  ;;  %v454_v30 = vpop.f32.mrf.mxu3 }
  0xe0   : > { %617 = vst.msk [vmem:[%s938_s13 + $0x74] sm:$0xf] %vm587_vm2, %v584_v25  ;;  %v435_v31 = vadd.f32 %v929_v24, %v434_v29  ;;  %v455_v32 = vadd.f32 %v929_v24, %v454_v30  ;;  %v396_v33 = vpop.f32.mrf.mxu0  ;;  %v416_v34 = vpop.f32.mrf.mxu1 }
  0xe1   : > { %594 = vst.msk [vmem:[%s938_s13 + $0x18] sm:$0xf] %vm587_vm2, %v561_v26  ;;  %v397_v35 = vadd.f32 %v929_v24, %v396_v33  ;;  %v417_v36 = vadd.f32 %v929_v24, %v416_v34 }
  0xe2   : > { %602 = vst.msk [vmem:[%s938_s13 + $0x38] sm:$0xf] %vm587_vm2, %v569_v28  ;;  %vm481_vm12 = vcmp.ge.f32.partialorder %v435_v31, 0.0  ;;  %v513_v37 = vmul.f32 0.1, %v435_v31  ;;  %vm489_vm13 = vcmp.ge.f32.partialorder %v455_v32, 0.0 }
  0xe3   : > { %v521_v38 = vmul.f32 0.1, %v455_v32  ;;  %vm466_vm14 = vcmp.ge.f32.partialorder %v397_v35, 0.0  ;;  %v498_v39 = vmul.f32 0.1, %v397_v35  ;;  %vm474_vm15 = vcmp.ge.f32.partialorder %v417_v36, 0.0 }
  0xe4   : > { %v545_v40 = vsel %vm481_vm12, %v435_v31, %v513_v37  ;;  %v506_v41 = vmul.f32 0.1, %v417_v36 }
  0xe5   : > { %v577_v42 = vpack.c.bf16 %v545_v40, %v545_v40  ;;  %v553_v43 = vsel %vm489_vm13, %v455_v32, %v521_v38  ;;  %v530_v44 = vsel %vm466_vm14, %v397_v35, %v498_v39 }
  0xe6   : > { %v585_v45 = vpack.c.bf16 %v553_v43, %v553_v43  ;;  %v562_v46 = vpack.c.bf16 %v530_v44, %v530_v44  ;;  %v538_v47 = vsel %vm474_vm15, %v417_v36, %v506_v41 }
  0xe7   : > { %610 = vst.msk [vmem:[%s938_s13 + $0x58] sm:$0xf] %vm587_vm2, %v577_v42  ;;  %v570_v48 = vpack.c.bf16 %v538_v47, %v538_v47  ;;  %v436_v49 = vpop.f32.mrf.mxu2  ;;  %v456_v50 = vpop.f32.mrf.mxu3 }
  0xe8   : > { %618 = vst.msk [vmem:[%s938_s13 + $0x78] sm:$0xf] %vm587_vm2, %v585_v45  ;;  %v437_v51 = vadd.f32 %v929_v24, %v436_v49  ;;  %v457_v52 = vadd.f32 %v929_v24, %v456_v50 }
  0xe9   : > { %595 = vst.msk [vmem:[%s938_s13 + $0x1c] sm:$0xf] %vm587_vm2, %v562_v46 }
  0xea   : > { %603 = vst.msk [vmem:[%s938_s13 + $0x3c] sm:$0xf] %vm587_vm2, %v570_v48  ;;  %vm482_vm0 = vcmp.ge.f32.partialorder %v437_v51, 0.0  ;;  %v514_v53 = vmul.f32 0.1, %v437_v51  ;;  %vm490_vm1 = vcmp.ge.f32.partialorder %v457_v52, 0.0 }
  0xeb   : > { %v522_v54 = vmul.f32 0.1, %v457_v52 }
  0xec   : > { %v546_v55 = vsel %vm482_vm0, %v437_v51, %v514_v53 }
  0xed   : > { %v578_v56 = vpack.c.bf16 %v546_v55, %v546_v55  ;;  %v554_v57 = vsel %vm490_vm1, %v457_v52, %v522_v54 }
  0xee   : > { %v586_v58 = vpack.c.bf16 %v554_v57, %v554_v57 }
  0xef   : > { %611 = vst.msk [vmem:[%s938_s13 + $0x5c] sm:$0xf] %vm587_vm2, %v578_v56 }
  0xf0   : > { %619 = vst.msk [vmem:[%s938_s13 + $0x7c] sm:$0xf] %vm587_vm2, %v586_v58 }
  0xf1 PF: > { %s13_s12 = sadd.s32 1, %s846_s12  }
  0xf2   : > { %p10_p4 = scmp.ge.s32.totalorder %s13_s12, 4  }
  0xf4   :  { %12 = sbr.rel (!%p10_p4) target bundleno = 1 (0x1), region = 62 }

</bundles_post_ra>
